<compile_context>
chip_gen: v6e
topology: v6e:2x2x1
jax: 0.10.0
libtpu: 0.0.40
codegen_flags: <defaults>
</compile_context>

<pallas_src>
import functools

import jax
import jax.numpy as jnp
from jax import lax
from jax.experimental import pallas as pl
from jax.experimental.pallas import tpu as pltpu


# --------------------------- fused APPNP kernel ------------------------------
def _appnp_fused_kernel(*refs, n_layers, alpha, tile_r):
    x_ref = refs[0]                               # (tile_r, in_pad)  bf16
    a_ref = refs[1]                               # (tile_r, n_pad)   bf16, (1-alpha) folded
    wb_refs = refs[2:2 + 2 * n_layers]            # [W0, b0, W1, b1, ...]
    o_ref = refs[2 + 2 * n_layers]                # (tile_r, c_pad)   f32 row tile
    h_even, h_odd, ah0 = refs[2 + 2 * n_layers + 1:]   # (n_pad, c_pad) bf16 scratches

    t = pl.program_id(0)                          # 0 = fused MLP, 1..k = prop step
    r = pl.program_id(1)                          # node-row tile
    row0 = pl.multiple_of(r * tile_r, tile_r)
    rows = pl.ds(row0, tile_r)

    # ---- t == 0 : fused MLP producing h^(0) for this row tile ---------------
    @pl.when(t == 0)
    def _mlp():
        h = x_ref[...]                            # bf16 (feat_drop = identity)
        y = None
        for li in range(n_layers):
            w = wb_refs[2 * li][...]              # bf16 (din_pad, dout_pad)
            b = wb_refs[2 * li + 1][...]          # f32  (1, dout_pad)
            y = jnp.dot(h, w, preferred_element_type=jnp.float32) + b
            if li < n_layers - 1:                 # activation (ReLU) on hidden layers
                y = jnp.maximum(y, 0.0)
                h = y.astype(jnp.bfloat16)
        h_even[rows, :] = y.astype(jnp.bfloat16)  # h^(0) as the next MXU operand
        ah0[rows, :] = (alpha * y).astype(jnp.bfloat16)   # alpha * h^(0), bf16
        # Output written every step (row-tile out_spec flushes each iteration);
        # if k == 0 this IS the final result, otherwise t == k overwrites it.
        o_ref[...] = y

    # ---- t >= 1 : h^(t) = (1-alpha) A_hat @ h^(t-1) + alpha h^(0) -----------
    def _step(h_src, h_dst):
        ah = jnp.dot(a_ref[...], h_src[...],
                     preferred_element_type=jnp.float32)   # (tile_r, c_pad) f32
        h_new = ah + ah0[rows, :].astype(jnp.float32)
        h_dst[rows, :] = h_new.astype(jnp.bfloat16)
        o_ref[...] = h_new                        # t == k is the last writer

    parity = lax.rem(t, 2)

    @pl.when((t > 0) & (parity == 1))
    def _odd_step():
        _step(h_even, h_odd)

    @pl.when((t > 0) & (parity == 0))
    def _even_step():
        _step(h_odd, h_even)


# ------------------------------ host wrapper ---------------------------------
def _round_up(v, m):
    return (v + m - 1) // m * m


def _pad2d(x, rows, cols):
    r, c = x.shape
    return jnp.pad(x, ((0, rows - r), (0, cols - c)))


def _vmem_budget_bytes():
    """Generation-aware usable-VMEM budget with headroom for Mosaic scratch."""
    cap = 64 * 1024 * 1024                        # conservative fallback (v7x physical)
    try:
        cap = int(pltpu.get_tpu_info().vmem_capacity_bytes)
    except Exception:
        pass
    # ~82% of physical: ~105 MiB on 128 MiB chips (v5e/v6e), ~52 MiB on v7x.
    return max(16 * 1024 * 1024, int(cap * 0.82))


def appnp_forward(a_hat, features, weights, biases, *, alpha, k):
    """APPNP forward: n_layers Linears (+ReLU) then k PPR propagation steps."""
    n_layers = len(weights)
    n, in_feats = features.shape
    n_classes = weights[-1].shape[1]
    k = int(k)
    assert k >= 0

    lane = 128
    d_pads = [_round_up(in_feats, lane)] + [_round_up(w.shape[1], lane)
                                            for w in weights]
    in_pad, c_pad = d_pads[0], d_pads[-1]

    budget = _vmem_budget_bytes()
    n128 = _round_up(n, lane)

    def est_bytes(tile_r, n_pad):
        return (2 * tile_r * in_pad * 2                       # x (double-buffered, bf16)
                + 2 * tile_r * n_pad * 2                      # A row slab
                + sum(2 * (d_pads[i] * d_pads[i + 1] * 2      # resident weights
                           + 8 * d_pads[i + 1] * 4)           # biases
                      for i in range(n_layers))
                + 2 * tile_r * c_pad * 4                      # output row tile (f32)
                + 3 * n_pad * c_pad * 2)                      # h ping/pong + alpha*h0 (bf16)

    # Largest row tile (multiple of 128) that fits the budget; tile_r == n128
    # makes A fully VMEM-resident (fetched once for all k steps).
    cands = [c for c in sorted({n128, 1024, 512, 256, 128}, reverse=True) if c <= n128]
    tile_r = cands[-1]
    for tr in cands:
        if est_bytes(tr, _round_up(n128, tr)) <= budget:
            tile_r = tr
            break
    n_pad = _round_up(n128, tile_r)
    num_r = n_pad // tile_r

    # Host-side prep: pad lanes/rows to 128, fold (1-alpha) into A, cast MXU
    # operands to bf16 (biases stay f32; all accumulation is f32).
    x_p = _pad2d(features, n_pad, in_pad).astype(jnp.bfloat16)
    a_p = _pad2d((1.0 - float(alpha)) * a_hat, n_pad, n_pad).astype(jnp.bfloat16)

    wb = []
    for li in range(n_layers):
        wb.append(_pad2d(weights[li], d_pads[li], d_pads[li + 1])
                  .astype(jnp.bfloat16))
        wb.append(_pad2d(biases[li], 1, d_pads[li + 1]).astype(jnp.float32))

    in_specs = [
        # x: streamed by row tile at t==0 only; pinned at block (0,0) for t>=1
        # (never read there) so the pipeline dedups the DMA -> no re-fetch.
        pl.BlockSpec((tile_r, in_pad), lambda t, r: (r * jnp.maximum(1 - t, 0), 0)),
        # A: pinned at block (0,0) at t==0 (never read there); streamed (or
        # resident when num_r==1) for t>=1 -> A is swept k times, not k+1.
        pl.BlockSpec((tile_r, n_pad), lambda t, r: (r * jnp.minimum(t, 1), 0)),
    ]
    for li in range(n_layers):
        din, dout = d_pads[li], d_pads[li + 1]
        in_specs.append(pl.BlockSpec((din, dout), lambda t, r: (0, 0)))  # W (resident)
        in_specs.append(pl.BlockSpec((1, dout), lambda t, r: (0, 0)))    # b (resident)

    est = est_bytes(tile_r, n_pad)
    vmem_limit = int(min(budget, max(16 * 1024 * 1024,
                                     int(est * 1.25) + (4 << 20))))

    kernel = functools.partial(_appnp_fused_kernel, n_layers=n_layers,
                               alpha=float(alpha), tile_r=tile_r)

    out = pl.pallas_call(
        kernel,
        out_shape=jax.ShapeDtypeStruct((n_pad, c_pad), jnp.float32),
        grid_spec=pltpu.PrefetchScalarGridSpec(
            num_scalar_prefetch=0,
            grid=(k + 1, num_r),
            in_specs=in_specs,
            # Row-tile output: flushed every iteration (overlaps with compute);
            # the kernel writes o_ref at EVERY grid point, t==k is the last writer.
            out_specs=pl.BlockSpec((tile_r, c_pad), lambda t, r: (r, 0)),
            scratch_shapes=[
                pltpu.VMEM((n_pad, c_pad), jnp.bfloat16),   # h ping (bf16 MXU operand)
                pltpu.VMEM((n_pad, c_pad), jnp.bfloat16),   # h pong
                pltpu.VMEM((n_pad, c_pad), jnp.bfloat16),   # alpha * h^(0)
            ],
        ),
        # Row tiles of step t+1 read ALL rows written at step t via the shared
        # scratch, so both grid axes must stay sequential ("arbitrary").
        compiler_params=pltpu.CompilerParams(
            dimension_semantics=("arbitrary", "arbitrary"),
            vmem_limit_bytes=vmem_limit),
    )(x_p, a_p, *wb)

    return out[:n, :n_classes]


if __name__ == "__main__":
    N = 128                      # number of graph nodes
    in_feats, n_hidden, n_classes = 32, 32, 16
    n_layers = 3
    alpha, k = 0.1, 4

    key = jax.random.PRNGKey(0)
    k_adj, k_feat, *k_params = jax.random.split(key, 2 + 2 * n_layers)

    # Deterministic random symmetric adjacency (no self loops), dense form.
    logits = jax.random.uniform(k_adj, (N, N))
    adj = (logits < 0.05).astype(jnp.float32)
    adj = jnp.maximum(adj, adj.T)
    adj = adj * (1.0 - jnp.eye(N, dtype=jnp.float32))

    # DGL APPNPConv normalization: D_in^{-1/2} A D_out^{-1/2}, degrees >= 1.
    deg_out = jnp.maximum(adj.sum(axis=0), 1.0)
    deg_in = jnp.maximum(adj.sum(axis=1), 1.0)
    a_hat = adj * (deg_in[:, None] ** -0.5) * (deg_out[None, :] ** -0.5)

    features = jax.random.normal(k_feat, (N, in_feats), dtype=jnp.float32)

    # Deterministic Linear parameters (uniform(-1/sqrt(fan_in), 1/sqrt(fan_in))
    # like nn.Linear.reset_parameters); stored as (in, out).
    dims = [in_feats] + [n_hidden] * (n_layers - 1) + [n_classes]
    weights, biases = [], []
    for i in range(n_layers):
        fan_in, fan_out = dims[i], dims[i + 1]
        bound = 1.0 / float(fan_in) ** 0.5
        w = jax.random.uniform(k_params[2 * i], (fan_in, fan_out),
                               minval=-bound, maxval=bound, dtype=jnp.float32)
        b = jax.random.uniform(k_params[2 * i + 1], (1, fan_out),
                               minval=-bound, maxval=bound, dtype=jnp.float32)
        weights.append(w)
        biases.append(b)

    out = appnp_forward(a_hat, features, weights, biases, alpha=alpha, k=k)
    out = jax.block_until_ready(out)

    # Pure-JAX reference with matching numerics (bf16 MXU operands, f32 acc,
    # alpha*h^(0) stored in bf16 exactly as the kernel does).
    h = features
    for i in range(n_layers):
        y = jnp.dot(h.astype(jnp.bfloat16), weights[i].astype(jnp.bfloat16),
                    preferred_element_type=jnp.float32) + biases[i]
        h = jnp.maximum(y, 0.0) if i < n_layers - 1 else y
    h0 = h
    a_s = ((1.0 - alpha) * a_hat).astype(jnp.bfloat16)
    alpha_h0 = (alpha * h0).astype(jnp.bfloat16).astype(jnp.float32)
    hb = h0.astype(jnp.bfloat16)
    ref = h0
    for _ in range(k):
        ref = jnp.dot(a_s, hb, preferred_element_type=jnp.float32) + alpha_h0
        hb = ref.astype(jnp.bfloat16)

    assert out.shape == (N, n_classes)
    assert jnp.allclose(out, ref, atol=2e-2, rtol=2e-2), "Pallas/JAX mismatch"

    print("KERNEL_OK")
</pallas_src>

<mosaic_0001>
module attributes {stable_mosaic.version = 11 : i64} {
  func.func @_appnp_fused_kernel(%arg0: i32, %arg1: i32, %arg2: memref<128x128xbf16, #tpu.memory_space<vmem>>, %arg3: memref<128x128xbf16, #tpu.memory_space<vmem>>, %arg4: memref<128x128xbf16, #tpu.memory_space<vmem>>, %arg5: memref<1x128xf32, #tpu.memory_space<vmem>>, %arg6: memref<128x128xbf16, #tpu.memory_space<vmem>>, %arg7: memref<1x128xf32, #tpu.memory_space<vmem>>, %arg8: memref<128x128xbf16, #tpu.memory_space<vmem>>, %arg9: memref<1x128xf32, #tpu.memory_space<vmem>>, %arg10: memref<128x128xf32, #tpu.memory_space<vmem>>, %arg11: memref<128x128xbf16, #tpu.memory_space<vmem>>, %arg12: memref<128x128xbf16, #tpu.memory_space<vmem>>, %arg13: memref<128x128xbf16, #tpu.memory_space<vmem>>) attributes {dimension_semantics = [#tpu.dimension_semantics<arbitrary>, #tpu.dimension_semantics<arbitrary>], iteration_bounds = array<i64: 5, 1>, scalar_prefetch = 0 : i64, scratch_operands = 3 : i64, tpu.core_type = #tpu.core_type<tc>, window_params = [{transform_indices = @transform_0, window_bounds = array<i64: 128, 128>}, {transform_indices = @transform_1, window_bounds = array<i64: 128, 128>}, {pipeline_mode = #tpu.pipeline_mode<synchronous>, transform_indices = @transform_2, window_bounds = array<i64: 128, 128>}, {pipeline_mode = #tpu.pipeline_mode<synchronous>, transform_indices = @transform_3, window_bounds = array<i64: 1, 128>}, {pipeline_mode = #tpu.pipeline_mode<synchronous>, transform_indices = @transform_4, window_bounds = array<i64: 128, 128>}, {pipeline_mode = #tpu.pipeline_mode<synchronous>, transform_indices = @transform_5, window_bounds = array<i64: 1, 128>}, {pipeline_mode = #tpu.pipeline_mode<synchronous>, transform_indices = @transform_6, window_bounds = array<i64: 128, 128>}, {pipeline_mode = #tpu.pipeline_mode<synchronous>, transform_indices = @transform_7, window_bounds = array<i64: 1, 128>}, {transform_indices = @transform_8, window_bounds = array<i64: 128, 128>}]} {
    %c128_i32 = arith.constant 128 : i32
    %0 = arith.muli %arg1, %c128_i32 : i32
    %1 = tpu.assume_multiple %0, 128 : i32
    %c0_i32 = arith.constant 0 : i32
    %2 = arith.cmpi eq, %arg0, %c0_i32 : i32
    %3 = arith.extui %2 : i1 to i32
    %c0_i32_0 = arith.constant 0 : i32
    %4 = arith.cmpi ne, %3, %c0_i32_0 : i32
    scf.if %4 {
      %c0 = arith.constant 0 : index
      %c0_6 = arith.constant 0 : index
      %16 = vector.load %arg2[%c0, %c0_6] : memref<128x128xbf16, #tpu.memory_space<vmem>>, vector<128x128xbf16>
      %c0_7 = arith.constant 0 : index
      %c0_8 = arith.constant 0 : index
      %17 = vector.load %arg4[%c0_7, %c0_8] : memref<128x128xbf16, #tpu.memory_space<vmem>>, vector<128x128xbf16>
      %c0_9 = arith.constant 0 : index
      %c0_10 = arith.constant 0 : index
      %18 = vector.load %arg5[%c0_9, %c0_10] : memref<1x128xf32, #tpu.memory_space<vmem>>, vector<1x128xf32>
      %cst = arith.constant dense<0.000000e+00> : vector<128x128xf32>
      %19 = tpu.matmul %16, %17, %cst {dimension_numbers = #tpu.dot_dimension_numbers<[1], [0], [0], [1], [0, 0, 1, 1], [], []>} : vector<128x128xbf16>, vector<128x128xbf16>, vector<128x128xf32> -> vector<128x128xf32>
      %20 = vector.broadcast %18 : vector<1x128xf32> to vector<128x128xf32>
      %21 = arith.addf %19, %20 : vector<128x128xf32>
      %cst_11 = arith.constant 0.000000e+00 : f32
      %22 = vector.broadcast %cst_11 : f32 to vector<128x128xf32>
      %23 = arith.maximumf %21, %22 : vector<128x128xf32>
      %24 = arith.truncf %23 : vector<128x128xf32> to vector<128x128xbf16>
      %c0_12 = arith.constant 0 : index
      %c0_13 = arith.constant 0 : index
      %25 = vector.load %arg6[%c0_12, %c0_13] : memref<128x128xbf16, #tpu.memory_space<vmem>>, vector<128x128xbf16>
      %c0_14 = arith.constant 0 : index
      %c0_15 = arith.constant 0 : index
      %26 = vector.load %arg7[%c0_14, %c0_15] : memref<1x128xf32, #tpu.memory_space<vmem>>, vector<1x128xf32>
      %cst_16 = arith.constant dense<0.000000e+00> : vector<128x128xf32>
      %27 = tpu.matmul %24, %25, %cst_16 {dimension_numbers = #tpu.dot_dimension_numbers<[1], [0], [0], [1], [0, 0, 1, 1], [], []>} : vector<128x128xbf16>, vector<128x128xbf16>, vector<128x128xf32> -> vector<128x128xf32>
      %28 = vector.broadcast %26 : vector<1x128xf32> to vector<128x128xf32>
      %29 = arith.addf %27, %28 : vector<128x128xf32>
      %cst_17 = arith.constant 0.000000e+00 : f32
      %30 = vector.broadcast %cst_17 : f32 to vector<128x128xf32>
      %31 = arith.maximumf %29, %30 : vector<128x128xf32>
      %32 = arith.truncf %31 : vector<128x128xf32> to vector<128x128xbf16>
      %c0_18 = arith.constant 0 : index
      %c0_19 = arith.constant 0 : index
      %33 = vector.load %arg8[%c0_18, %c0_19] : memref<128x128xbf16, #tpu.memory_space<vmem>>, vector<128x128xbf16>
      %c0_20 = arith.constant 0 : index
      %c0_21 = arith.constant 0 : index
      %34 = vector.load %arg9[%c0_20, %c0_21] : memref<1x128xf32, #tpu.memory_space<vmem>>, vector<1x128xf32>
      %cst_22 = arith.constant dense<0.000000e+00> : vector<128x128xf32>
      %35 = tpu.matmul %32, %33, %cst_22 {dimension_numbers = #tpu.dot_dimension_numbers<[1], [0], [0], [1], [0, 0, 1, 1], [], []>} : vector<128x128xbf16>, vector<128x128xbf16>, vector<128x128xf32> -> vector<128x128xf32>
      %36 = vector.broadcast %34 : vector<1x128xf32> to vector<128x128xf32>
      %37 = arith.addf %35, %36 : vector<128x128xf32>
      %38 = arith.truncf %37 : vector<128x128xf32> to vector<128x128xbf16>
      %39 = arith.index_cast %1 : i32 to index
      %c0_23 = arith.constant 0 : index
      %40 = vector.load %arg11[%39, %c0_23] : memref<128x128xbf16, #tpu.memory_space<vmem>>, vector<128x128xbf16>
      tpu.vector_store %arg11[%39, %c0_23], %38 {strides = array<i32>} : memref<128x128xbf16, #tpu.memory_space<vmem>>, vector<128x128xbf16>,
      %cst_24 = arith.constant 1.000000e-01 : f32
      %41 = vector.broadcast %cst_24 : f32 to vector<128x128xf32>
      %42 = arith.mulf %41, %37 : vector<128x128xf32>
      %43 = arith.truncf %42 : vector<128x128xf32> to vector<128x128xbf16>
      %44 = arith.index_cast %1 : i32 to index
      %c0_25 = arith.constant 0 : index
      %45 = vector.load %arg13[%44, %c0_25] : memref<128x128xbf16, #tpu.memory_space<vmem>>, vector<128x128xbf16>
      tpu.vector_store %arg13[%44, %c0_25], %43 {strides = array<i32>} : memref<128x128xbf16, #tpu.memory_space<vmem>>, vector<128x128xbf16>,
      %c0_26 = arith.constant 0 : index
      %c0_27 = arith.constant 0 : index
      %46 = vector.load %arg10[%c0_26, %c0_27] : memref<128x128xf32, #tpu.memory_space<vmem>>, vector<128x128xf32>
      tpu.vector_store %arg10[%c0_26, %c0_27], %37 {strides = array<i32>} : memref<128x128xf32, #tpu.memory_space<vmem>>, vector<128x128xf32>,
    } else {
    }
    %c2_i32 = arith.constant 2 : i32
    %5 = arith.remsi %arg0, %c2_i32 : i32
    %c0_i32_1 = arith.constant 0 : i32
    %6 = arith.cmpi sgt, %arg0, %c0_i32_1 : i32
    %c1_i32 = arith.constant 1 : i32
    %7 = arith.cmpi eq, %5, %c1_i32 : i32
    %8 = arith.andi %6, %7 : i1
    %9 = arith.extui %8 : i1 to i32
    %c0_i32_2 = arith.constant 0 : i32
    %10 = arith.cmpi ne, %9, %c0_i32_2 : i32
    scf.if %10 {
      %c0 = arith.constant 0 : index
      %c0_6 = arith.constant 0 : index
      %16 = vector.load %arg3[%c0, %c0_6] : memref<128x128xbf16, #tpu.memory_space<vmem>>, vector<128x128xbf16>
      %c0_7 = arith.constant 0 : index
      %c0_8 = arith.constant 0 : index
      %17 = vector.load %arg11[%c0_7, %c0_8] : memref<128x128xbf16, #tpu.memory_space<vmem>>, vector<128x128xbf16>
      %cst = arith.constant dense<0.000000e+00> : vector<128x128xf32>
      %18 = tpu.matmul %16, %17, %cst {dimension_numbers = #tpu.dot_dimension_numbers<[1], [0], [0], [1], [0, 0, 1, 1], [], []>} : vector<128x128xbf16>, vector<128x128xbf16>, vector<128x128xf32> -> vector<128x128xf32>
      %19 = arith.index_cast %1 : i32 to index
      %c0_9 = arith.constant 0 : index
      %20 = vector.load %arg13[%19, %c0_9] : memref<128x128xbf16, #tpu.memory_space<vmem>>, vector<128x128xbf16>
      %21 = arith.extf %20 : vector<128x128xbf16> to vector<128x128xf32>
      %22 = arith.addf %18, %21 : vector<128x128xf32>
      %23 = arith.truncf %22 : vector<128x128xf32> to vector<128x128xbf16>
      %24 = arith.index_cast %1 : i32 to index
      %c0_10 = arith.constant 0 : index
      %25 = vector.load %arg12[%24, %c0_10] : memref<128x128xbf16, #tpu.memory_space<vmem>>, vector<128x128xbf16>
      tpu.vector_store %arg12[%24, %c0_10], %23 {strides = array<i32>} : memref<128x128xbf16, #tpu.memory_space<vmem>>, vector<128x128xbf16>,
      %c0_11 = arith.constant 0 : index
      %c0_12 = arith.constant 0 : index
      %26 = vector.load %arg10[%c0_11, %c0_12] : memref<128x128xf32, #tpu.memory_space<vmem>>, vector<128x128xf32>
      tpu.vector_store %arg10[%c0_11, %c0_12], %22 {strides = array<i32>} : memref<128x128xf32, #tpu.memory_space<vmem>>, vector<128x128xf32>,
    } else {
    }
    %c0_i32_3 = arith.constant 0 : i32
    %11 = arith.cmpi sgt, %arg0, %c0_i32_3 : i32
    %c0_i32_4 = arith.constant 0 : i32
    %12 = arith.cmpi eq, %5, %c0_i32_4 : i32
    %13 = arith.andi %11, %12 : i1
    %14 = arith.extui %13 : i1 to i32
    %c0_i32_5 = arith.constant 0 : i32
    %15 = arith.cmpi ne, %14, %c0_i32_5 : i32
    scf.if %15 {
      %c0 = arith.constant 0 : index
      %c0_6 = arith.constant 0 : index
      %16 = vector.load %arg3[%c0, %c0_6] : memref<128x128xbf16, #tpu.memory_space<vmem>>, vector<128x128xbf16>
      %c0_7 = arith.constant 0 : index
      %c0_8 = arith.constant 0 : index
      %17 = vector.load %arg12[%c0_7, %c0_8] : memref<128x128xbf16, #tpu.memory_space<vmem>>, vector<128x128xbf16>
      %cst = arith.constant dense<0.000000e+00> : vector<128x128xf32>
      %18 = tpu.matmul %16, %17, %cst {dimension_numbers = #tpu.dot_dimension_numbers<[1], [0], [0], [1], [0, 0, 1, 1], [], []>} : vector<128x128xbf16>, vector<128x128xbf16>, vector<128x128xf32> -> vector<128x128xf32>
      %19 = arith.index_cast %1 : i32 to index
      %c0_9 = arith.constant 0 : index
      %20 = vector.load %arg13[%19, %c0_9] : memref<128x128xbf16, #tpu.memory_space<vmem>>, vector<128x128xbf16>
      %21 = arith.extf %20 : vector<128x128xbf16> to vector<128x128xf32>
      %22 = arith.addf %18, %21 : vector<128x128xf32>
      %23 = arith.truncf %22 : vector<128x128xf32> to vector<128x128xbf16>
      %24 = arith.index_cast %1 : i32 to index
      %c0_10 = arith.constant 0 : index
      %25 = vector.load %arg11[%24, %c0_10] : memref<128x128xbf16, #tpu.memory_space<vmem>>, vector<128x128xbf16>
      tpu.vector_store %arg11[%24, %c0_10], %23 {strides = array<i32>} : memref<128x128xbf16, #tpu.memory_space<vmem>>, vector<128x128xbf16>,
      %c0_11 = arith.constant 0 : index
      %c0_12 = arith.constant 0 : index
      %26 = vector.load %arg10[%c0_11, %c0_12] : memref<128x128xf32, #tpu.memory_space<vmem>>, vector<128x128xf32>
      tpu.vector_store %arg10[%c0_11, %c0_12], %22 {strides = array<i32>} : memref<128x128xf32, #tpu.memory_space<vmem>>, vector<128x128xf32>,
    } else {
    }
    return
  }
  func.func @transform_0(%arg0: i32, %arg1: i32) -> (i32, i32) {
    %c1_i32 = arith.constant 1 : i32
    %0 = arith.subi %c1_i32, %arg0 : i32
    %c0_i32 = arith.constant 0 : i32
    %1 = arith.maxsi %0, %c0_i32 : i32
    %2 = arith.muli %arg1, %1 : i32
    %c0_i32_0 = arith.constant 0 : i32
    %c0_i32_1 = arith.constant 0 : i32
    return %2, %c0_i32_0 : i32, i32
  }
  func.func @transform_1(%arg0: i32, %arg1: i32) -> (i32, i32) {
    %c1_i32 = arith.constant 1 : i32
    %0 = arith.minsi %arg0, %c1_i32 : i32
    %1 = arith.muli %arg1, %0 : i32
    %c0_i32 = arith.constant 0 : i32
    %c0_i32_0 = arith.constant 0 : i32
    return %1, %c0_i32 : i32, i32
  }
  func.func @transform_2(%arg0: i32, %arg1: i32) -> (i32, i32) {
    %c0_i32 = arith.constant 0 : i32
    %c0_i32_0 = arith.constant 0 : i32
    %c0_i32_1 = arith.constant 0 : i32
    return %c0_i32, %c0_i32_0 : i32, i32
  }
  func.func @transform_3(%arg0: i32, %arg1: i32) -> (i32, i32) {
    %c0_i32 = arith.constant 0 : i32
    %c0_i32_0 = arith.constant 0 : i32
    %c0_i32_1 = arith.constant 0 : i32
    return %c0_i32, %c0_i32_0 : i32, i32
  }
  func.func @transform_4(%arg0: i32, %arg1: i32) -> (i32, i32) {
    %c0_i32 = arith.constant 0 : i32
    %c0_i32_0 = arith.constant 0 : i32
    %c0_i32_1 = arith.constant 0 : i32
    return %c0_i32, %c0_i32_0 : i32, i32
  }
  func.func @transform_5(%arg0: i32, %arg1: i32) -> (i32, i32) {
    %c0_i32 = arith.constant 0 : i32
    %c0_i32_0 = arith.constant 0 : i32
    %c0_i32_1 = arith.constant 0 : i32
    return %c0_i32, %c0_i32_0 : i32, i32
  }
  func.func @transform_6(%arg0: i32, %arg1: i32) -> (i32, i32) {
    %c0_i32 = arith.constant 0 : i32
    %c0_i32_0 = arith.constant 0 : i32
    %c0_i32_1 = arith.constant 0 : i32
    return %c0_i32, %c0_i32_0 : i32, i32
  }
  func.func @transform_7(%arg0: i32, %arg1: i32) -> (i32, i32) {
    %c0_i32 = arith.constant 0 : i32
    %c0_i32_0 = arith.constant 0 : i32
    %c0_i32_1 = arith.constant 0 : i32
    return %c0_i32, %c0_i32_0 : i32, i32
  }
  func.func @transform_8(%arg0: i32, %arg1: i32) -> (i32, i32) {
    %c0_i32 = arith.constant 0 : i32
    %c0_i32_0 = arith.constant 0 : i32
    return %arg1, %c0_i32 : i32, i32
  }
}

</mosaic_0001>

<bundles_post_ra>
// kernel: tpu_custom_call.1
= control target key start
LH: loop header
LB: loop body
LE: loop exit
PB: predicated region body
PF: predicated region fallthrough
CT: control target
= control target key end

     0   :  { %13 = vsyncpa [#allocation6], 0  ;;  %s3498_s0 = inlined_call_operand.hbm [shape: bf16[128,128], index: 0, kind: input, shape index: {}]   ;;  %s3499_s1 = inlined_call_operand.hbm [shape: bf16[128,128], index: 1, kind: input, shape index: {}]   ;;  %s3500_s2 = inlined_call_operand.hbm [shape: bf16[128,128], index: 2, kind: input, shape index: {}]   ;;  %s3501_s3 = inlined_call_operand.vmem [shape: f32[1,128], index: 3, kind: input, shape index: {}]   ;;  %s3502_s4 = inlined_call_operand.hbm [shape: bf16[128,128], index: 4, kind: input, shape index: {}]   ;;  %s3503_s5 = inlined_call_operand.vmem [shape: f32[1,128], index: 5, kind: input, shape index: {}]   ;;  %s3504_s6 = inlined_call_operand.hbm [shape: bf16[128,128], index: 6, kind: input, shape index: {}]   ;;  %s3505_s7 = inlined_call_operand.vmem [shape: f32[1,128], index: 7, kind: input, shape index: {}]   ;;  %s3506_s8 = inlined_call_operand.hbm [shape: f32[128,128], index: 8, kind: output, shape index: {}]  }
   0x1   :  { %15 = vsyncpa [#allocation6 + $0x1], 0 }
   0x2   :  { %16 = vsyncpa [#allocation9], 0 }
   0x3   :  { %18 = vsyncpa [#allocation9 + $0x1], 0 }
   0x4   :  { %19 = vsyncpa [#allocation12], 0 }
   0x5   :  { %20 = vsyncpa [#allocation7], 0  ;;  %s3308_s27 = smov 0   ;;  %s3310_s28 = smov 0  }
   0x6   :  { %s3312_s29 = smov 0  }
   0x7 LB: > { %s3324_s30 = sadd.s32 4294967295, %s3251_s29   ;;  %s38_s9 = sadd.s32 1, %s3247_s28  ;;  %s3251_s29 = sphi %s3312_s29, %s26_s29   ;;  %s3247_s28 = sphi %s3310_s28, %s3511_s28   ;;  %s3243_s27 = sphi %s3308_s27, %s3510_s27  }
   0x8   : > { %p40_p0 = scmp.ge.s32.totalorder %s38_s9, 5  ;;  %p2135_p1 = scmp.ge.s32.totalorder %s3251_s29, 1 }
   0x9   : > { %p261_p2 = scmp.lt.s32.totalorder %s3251_s29, 6  ;;  %p2944_p4 = scmp.eq.s32.totalorder %s3324_s30, 0 }
   0xa   : > { %s3513_s9 = smov (%p40_p0, %s38_s9), 0  ;;  %s3253_s11 = smov [#allocation10]  }
   0xb   : > { %p3331_p3 = pnand %p2135_p1, %p261_p2  ;;  %s273_s12 = sshll.u32 %s3253_s11, 4  ;;  %s274_s12 = int_to_ptr.vmem [resolvable:$true] %s273_s12 }
   0xc   : > { %s3254_s14 = smov [#allocation11]   ;;  %s3066_s16 = scalar_lea.vmem %s274_s12, 1024 }
   0xd   : > { %p2927_p5 = pneg %p3331_p3  ;;  %s289_s15 = sshll.u32 %s3254_s14, 4  ;;  %s290_s15 = int_to_ptr.vmem [resolvable:$true] %s289_s15 }
   0xe   : > { %p3067_p8 = scmp.ne.s32.totalorder %s274_s12, %s3066_s16  ;;  %p3074_p11 = scmp.lt.s32.totalorder %s274_s12, %s274_s12 }
   0xf   : > { %p3340_p6 = pnand %p2944_p4, %p2927_p5  ;;  %p3075_p12 = scmp.lt.s32.totalorder %s3066_s16, %s3066_s16 }
  0x11   : > { %p3057_p7 = pneg %p3340_p6  ;;  %p3076_p13 = por %p3075_p12, %p3074_p11 }
  0x13   : > { %p3069_p9 = pnand %p3067_p8, %p3057_p7 }
  0x15   : > { %p3070_p10 = pneg %p3069_p9 }
  0x17   : > { %p3077_p0 = pnand %p3076_p13, %p3070_p10 }
  0x19   : > { %3080 = shalt.err (!%p3077_p0)
}
  0x1a   : > { %s3255_s17 = smov 64   ;;  %s3256_s18 = smov 4  }
  0x1b   : > { %2930 = dma.hbm_to_vmem [thread:$0]  (!%p3340_p6), %s3500_s2, 1024, %s274_s12, [#allocation9], %s3255_s17, %s3255_s17, %s3256_s18  }
  0x1c   : > { %s3092_s21 = scalar_lea.vmem %s290_s15, 1024  ;;  %p3100_p8 = scmp.lt.s32.totalorder %s290_s15, %s290_s15 }
  0x1d   : > { %p3093_p1 = scmp.ne.s32.totalorder %s290_s15, %s3092_s21  ;;  %p3101_p9 = scmp.lt.s32.totalorder %s3092_s21, %s3092_s21 }
  0x1f   : > { %p3095_p2 = pnand %p3093_p1, %p3057_p7  ;;  %p3102_p10 = por %p3101_p9, %p3100_p8 }
  0x21   : > { %p3096_p5 = pneg %p3095_p2 }
  0x23   : > { %p3103_p11 = pnand %p3102_p10, %p3096_p5 }
  0x25   : > { %3106 = shalt.err (!%p3103_p11)
}
  0x26   : > { %2933 = dma.hbm_to_vmem [thread:$0]  (!%p3340_p6), %s3502_s4, 1024, %s290_s15, [#allocation12], %s3255_s17, %s3255_s17, %s3256_s18  }
  0x27   : > { %s3257_s24 = smov [#allocation13]   ;;  %p2947_p12 = scmp.lt.s32.totalorder %s3251_s29, 5 }
  0x28   : > { %s305_s25 = sshll.u32 %s3257_s24, 4  ;;  %p2948_p13 = scmp.eq.s32.totalorder %s3251_s29, 0  ;;  %s306_s25 = int_to_ptr.vmem [resolvable:$true] %s305_s25 }
  0x29   : > { %s3118_s26 = scalar_lea.vmem %s306_s25, 1024  ;;  %p3126_p5 = scmp.lt.s32.totalorder %s306_s25, %s306_s25 }
  0x2a   : > { %p3119_p0 = scmp.ne.s32.totalorder %s306_s25, %s3118_s26  ;;  %p3127_p8 = scmp.lt.s32.totalorder %s3118_s26, %s3118_s26 }
  0x2c   : > { %p3121_p1 = pnand %p3119_p0, %p3057_p7  ;;  %p3128_p9 = por %p3127_p8, %p3126_p5 }
  0x2e   : > { %p3122_p2 = pneg %p3121_p1 }
  0x30   : > { %p3129_p10 = pnand %p3128_p9, %p3122_p2 }
  0x32   : > { %3132 = shalt.err (!%p3129_p10)
}
  0x33   : > { %2936 = dma.hbm_to_vmem [thread:$0]  (!%p3340_p6), %s3504_s6, 1024, %s306_s25, [#allocation12], %s3255_s17, %s3255_s17, %s3256_s18  }
  0x34   : > { %p3383_p11 = pnand %p2948_p13, %p2947_p12  ;;  %s3258_s15 = smov [#allocation5]  }
  0x35   : > { %s337_s16 = sshll.u32 %s3258_s15, 4  ;;  %s347_s19 = sand.u32 1, %s3251_s29   ;;  %s338_s16 = int_to_ptr.vmem [resolvable:$true] %s337_s16 }
  0x36   : > { %p3135_p7 = pneg %p3383_p11  ;;  %s3144_s13 = scalar_lea.vmem %s338_s16, 1024 }
  0x37   : > { %p3145_p0 = scmp.ne.s32.totalorder %s338_s16, %s3144_s13  ;;  %s3151_s20 = scalar_lea.vmem %s338_s16, 2048 }
  0x38   : > { %p3152_p6 = scmp.lt.s32.totalorder %s338_s16, %s338_s16  ;;  %p3153_p12 = scmp.lt.s32.totalorder %s3151_s20, %s3144_s13 }
  0x39   : > { %p3147_p1 = pnand %p3145_p0, %p3135_p7 }
  0x3a   : > { %p3154_p13 = por %p3153_p12, %p3152_p6 }
  0x3b   : > { %p3148_p2 = pneg %p3147_p1 }
  0x3d   : > { %p3155_p5 = pnand %p3154_p13, %p3148_p2 }
  0x3f   : > { %3158 = shalt.err (!%p3155_p5)
}
  0x40   : > { %2940 = dma.hbm_to_vmem [thread:$0]  (!%p3383_p11), %s3498_s0, 1024, %s338_s16, [#allocation6], %s3255_s17, %s3255_s17, %s3256_s18  }
  0x41   : > { %s3259_s23 = smov [#allocation8]   ;;  %s348_s25 = scalar_lea.sflag [#allocation9], %s347_s19 }
  0x42   : > { %s361_s24 = sshll.u32 %s3259_s23, 4  ;;  %s362_s24 = int_to_ptr.vmem [resolvable:$true] %s361_s24 }
  0x43   : > { %s3170_s26 = scalar_lea.vmem %s362_s24, 1024  ;;  %s3177_s11 = scalar_lea.vmem %s362_s24, 2048 }
  0x44   : > { %p3171_p8 = scmp.ne.s32.totalorder %s362_s24, %s3170_s26  ;;  %p3178_p0 = scmp.lt.s32.totalorder %s362_s24, %s362_s24 }
  0x45   : > { %p3179_p1 = scmp.lt.s32.totalorder %s3177_s11, %s3170_s26 }
  0x46   : > { %p3173_p9 = pnand %p3171_p8, %p3135_p7 }
  0x47   : > { %p3180_p2 = por %p3179_p1, %p3178_p0 }
  0x48   : > { %p3174_p10 = pneg %p3173_p9 }
  0x4a   : > { %p3181_p6 = pnand %p3180_p2, %p3174_p10 }
  0x4c   : > { %3184 = shalt.err (!%p3181_p6)
}
  0x4d   : > { %2943 = dma.hbm_to_vmem [thread:$0]  (!%p3383_p11), %s3499_s1, 1024, %s362_s24, %s348_s25, %s3255_s17, %s3255_s17, %s3256_s18  }
  0x4e   : > { %373 = sbr.rel (%p3331_p3) target bundleno = 1304 (0x518), region = 52 }
  0x53   : > { %3222 = dma.done.wait (%p2944_p4), [#allocation6], 1024  }
  0x54   : > { %3224 = vsyncadd (%p2944_p4), [#allocation6], 4294966272  ;;  %s384_s16 = sand.u32 1, %s3324_s30  }
  0x55   : > { %s385_s14 = scalar_lea.sflag [#allocation9], %s384_s16 }
  0x56   : > { %3226 = dma.done.wait (%p2944_p4), %s385_s14, 1024  }
  0x57   : > { %3228 = vsyncadd (%p2944_p4), %s385_s14, 4294966272 }
  0x58   : > { %3230 = dma.done.wait (%p2944_p4), [#allocation9], 1024  }
  0x59   : > { %3232 = vsyncadd (%p2944_p4), [#allocation9], 4294966272 }
  0x5a   : > { %3234 = dma.done.wait (%p2944_p4), [#allocation12], 2048  }
  0x5b   : > { %3236 = vsyncadd (%p2944_p4), [#allocation12], 4294965248  ;;  %p2148_p3 = scmp.ne.s32.totalorder %s3243_s27, 0 }
  0x5d   : > { %448 = sbr.rel (%p2148_p3) target bundleno = 773 (0x305), region = 76 }
  0x62   : > { %v2991_v0 = vld [vmem:[#allocation10 + $0x38] sm:$0xff]   ;;  %v2992_v1 = vld [vmem:[#allocation10 + $0x30] sm:$0xff]   ;;  %v2993_v2 = vld [vmem:[#allocation10 + $0x28] sm:$0xff]  }
  0x63   : > { %2695 = vmatprep.subr.bf16.mxu0 %v2991_v0  ;;  %v2994_v3 = vld [vmem:[#allocation10 + $0x20] sm:$0xff]   ;;  %v2995_v5 = vld [vmem:[#allocation10 + $0x18] sm:$0xff]   ;;  %v2996_v6 = vld [vmem:[#allocation10 + $0x10] sm:$0xff]  }
  0x64   : > { %2696 = vmatpush3.bf16.msra.mxu0 %v2991_v0  ;;  %v2999_v4 = vld [vmem:[#allocation5] sm:$0xff]   ;;  %v3007_v7 = vld [vmem:[#allocation11 + $0x38] sm:$0xff]   ;;  %v3008_v8 = vld [vmem:[#allocation11 + $0x30] sm:$0xff]  }
  0x65   : > { %2697 = vmatprep.subr.bf16.mxu0 %v2992_v1  ;;  %2711 = vmatprep.mubr.bf16.mxu0 %v2999_v4  ;;  %v2997_v9 = vld [vmem:[#allocation10 + $0x8] sm:$0xff]   ;;  %v2998_v11 = vld [vmem:[#allocation10] sm:$0xff]   ;;  %v3011_v13 = vld [vmem:[#allocation11 + $0x18] sm:$0xff]  }
  0x66   : > { %2727 = vmatprep.subr.bf16.mxu1 %v3007_v7  ;;  %v3009_v10 = vld [vmem:[#allocation11 + $0x28] sm:$0xff]   ;;  %v3010_v12 = vld [vmem:[#allocation11 + $0x20] sm:$0xff]   ;;  %v3001_v15 = vld [vmem:[#allocation5 + $0x10] sm:$0xff]  }
  0x67   : > { %2728 = vmatpush3.bf16.msra.mxu1 %v3007_v7  ;;  %v3000_v14 = vld [vmem:[#allocation5 + $0x8] sm:$0xff]   ;;  %v3002_v16 = vld [vmem:[#allocation5 + $0x18] sm:$0xff]   ;;  %v3003_v17 = vld [vmem:[#allocation5 + $0x20] sm:$0xff]  }
  0x68   : > { %2698 = vmatpush3.bf16.msra.mxu0 %v2992_v1  ;;  %2729 = vmatprep.subr.bf16.mxu1 %v3008_v8  ;;  %v3004_v18 = vld [vmem:[#allocation5 + $0x28] sm:$0xff]   ;;  %v3005_v19 = vld [vmem:[#allocation5 + $0x30] sm:$0xff]   ;;  %v3006_v20 = vld [vmem:[#allocation5 + $0x38] sm:$0xff]  }
  0x69   : > { %2699 = vmatprep.subr.bf16.mxu0 %v2993_v2  ;;  %v3012_v21 = vld [vmem:[#allocation11 + $0x10] sm:$0xff]   ;;  %v3013_v22 = vld [vmem:[#allocation11 + $0x8] sm:$0xff]   ;;  %v3014_v23 = vld [vmem:[#allocation11] sm:$0xff]  }
  0x6a   : > { %v3015_v24 = vld [vmem:[#allocation13 + $0x38] sm:$0xff]   ;;  %v3016_v25 = vld [vmem:[#allocation13 + $0x30] sm:$0xff]   ;;  %v3017_v26 = vld [vmem:[#allocation13 + $0x28] sm:$0xff]  }
  0x6b   : > { %2730 = vmatpush3.bf16.msra.mxu1 %v3008_v8  ;;  %v3018_v27 = vld [vmem:[#allocation13 + $0x20] sm:$0xff]   ;;  %v3432_v28 = vld [vmem:[#allocation13 + $0x18] sm:$0xff]  }
  0x6c   : > { %2700 = vmatpush3.bf16.msra.mxu0 %v2993_v2  ;;  %2731 = vmatprep.subr.bf16.mxu1 %v3009_v10  ;;  %v2149_v31 = vld [vmem:[%s3501_s3] ss:$0 sm:$0xff] }
  0x6d   : > { %2701 = vmatprep.subr.bf16.mxu0 %v2994_v3 }
  0x6f   : > { %2732 = vmatpush3.bf16.msra.mxu1 %v3009_v10 }
  0x70   : > { %2702 = vmatpush3.bf16.msra.mxu0 %v2994_v3  ;;  %2733 = vmatprep.subr.bf16.mxu1 %v3010_v12 }
  0x71   : > { %2703 = vmatprep.subr.bf16.mxu0 %v2995_v5 }
  0x73   : > { %2734 = vmatpush3.bf16.msra.mxu1 %v3010_v12 }
  0x74   : > { %2704 = vmatpush3.bf16.msra.mxu0 %v2995_v5  ;;  %2735 = vmatprep.subr.bf16.mxu1 %v3011_v13 }
  0x75   : > { %2705 = vmatprep.subr.bf16.mxu0 %v2996_v6 }
  0x77   : > { %2736 = vmatpush3.bf16.msra.mxu1 %v3011_v13 }
  0x78   : > { %2706 = vmatpush3.bf16.msra.mxu0 %v2996_v6  ;;  %2737 = vmatprep.subr.bf16.mxu1 %v3012_v21 }
  0x79   : > { %2707 = vmatprep.subr.bf16.mxu0 %v2997_v9 }
  0x7b   : > { %2738 = vmatpush3.bf16.msra.mxu1 %v3012_v21 }
  0x7c   : > { %2708 = vmatpush3.bf16.msra.mxu0 %v2997_v9  ;;  %2739 = vmatprep.subr.bf16.mxu1 %v3013_v22 }
  0x7d   : > { %2709 = vmatprep.subr.bf16.mxu0 %v2998_v11 }
  0x7f   : > { %2740 = vmatpush3.bf16.msra.mxu1 %v3013_v22  ;;  %v3020_v22 = vld [vmem:[#allocation13 + $0x10] sm:$0xff]  }
  0x80   : > { %2710 = vmatpush3.bf16.msra.mxu0 %v2998_v11  ;;  %2741 = vmatprep.subr.bf16.mxu1 %v3014_v23 }
  0x81   : > { %2759 = vmatprep.subr.bf16.mxu0 %v3015_v24 }
  0x83   : > { %2712 = vmatmul.mubr.bf16.vlgmr.msra.gmra.mxu0 %v3000_v14  ;;  %2742 = vmatpush3.bf16.msra.mxu1 %v3014_v23  ;;  %v3021_v23 = vld [vmem:[#allocation13 + $0x8] sm:$0xff]  }
  0x84   : > { %2715 = vmatprep.mubr.bf16.mxu0 %v3001_v15  ;;  %2855 = vmatprep.subr.bf16.mxu1 %v3015_v24 }
  0x85   : > { %2760 = vmatpush3.bf16.msra.mxu0 %v3015_v24 }
  0x86   : > { %2761 = vmatprep.subr.bf16.mxu0 %v3016_v25 }
  0x89   : > { %2762 = vmatpush3.bf16.msra.mxu0 %v3016_v25 }
  0x8a   : > { %2763 = vmatprep.subr.bf16.mxu0 %v3017_v26 }
  0x8b   : > { %2716 = vmatmul.mubr.bf16.gmra.mxu0 %v3002_v16 }
  0x8c   : > { %2719 = vmatprep.mubr.bf16.mxu0 %v3003_v17 }
  0x8d   : > { %2764 = vmatpush3.bf16.msra.mxu0 %v3017_v26 }
  0x8e   : > { %2765 = vmatprep.subr.bf16.mxu0 %v3018_v27 }
  0x91   : > { %2766 = vmatpush3.bf16.msra.mxu0 %v3018_v27 }
  0x92   : > { %2767 = vmatprep.subr.bf16.mxu0 %v3432_v28 }
  0x93   : > { %2720 = vmatmul.mubr.bf16.gmra.mxu0 %v3004_v18 }
  0x94   : > { %2723 = vmatprep.mubr.bf16.mxu0 %v3005_v19 }
  0x95   : > { %2768 = vmatpush3.bf16.msra.mxu0 %v3432_v28 }
  0x96   : > { %2769 = vmatprep.subr.bf16.mxu0 %v3020_v22 }
  0x99   : > { %2770 = vmatpush3.bf16.msra.mxu0 %v3020_v22 }
  0x9a   : > { %2771 = vmatprep.subr.bf16.mxu0 %v3021_v23 }
  0x9b   : > { %2724 = vmatmul.mubr.bf16.gmra.mxu0 %v3006_v20 }
  0x9d   : > { %2772 = vmatpush3.bf16.msra.mxu0 %v3021_v23 }
 0x143   : > { %v2713_v29 = vpop.f32.mrf.mxu0 }
 0x144   : > { %v627_v35 = vadd.f32 %v2713_v29, %v2149_v31 }
 0x145   : > { %v618_v30 = vpop.f32.mrf.mxu0 }
 0x146   : > { %v619_v33 = vadd.f32 %v2149_v31, %v618_v30  ;;  %v683_v42 = vmax.f32 %v627_v35, 0.0 }
 0x147   : > { %v2714_v32 = vpop.f32.mrf.mxu0 }
 0x148   : > { %v630_v34 = vadd.f32 %v2714_v32, %v2149_v31  ;;  %v681_v40 = vmax.f32 %v619_v33, 0.0 }
 0x149   : > { %v621_v36 = vpop.f32.mrf.mxu0 }
 0x14a   : > { %v622_v37 = vadd.f32 %v2149_v31, %v621_v36  ;;  %v684_v38 = vmax.f32 %v630_v34, 0.0 }
 0x14b   : > { %v2717_v39 = vpop.f32.mrf.mxu0 }
 0x14c   : > { %v682_v41 = vmax.f32 %v622_v37, 0.0  ;;  %v698_v45 = vpack.c.bf16 %v684_v38, %v683_v42  ;;  %v643_v49 = vadd.f32 %v2717_v39, %v2149_v31 }
 0x14d   : > { %v634_v43 = vpop.f32.mrf.mxu0 }
 0x14e   : > { %v697_v44 = vpack.c.bf16 %v682_v41, %v681_v40  ;;  %v635_v47 = vadd.f32 %v2149_v31, %v634_v43  ;;  %v687_v56 = vmax.f32 %v643_v49, 0.0 }
 0x14f   : > { %v2718_v46 = vpop.f32.mrf.mxu0 }
 0x150   : > { %v646_v48 = vadd.f32 %v2718_v46, %v2149_v31  ;;  %2743 = vmatprep.mubr.bf16.mxu1 %v697_v44  ;;  %v685_v54 = vmax.f32 %v635_v47, 0.0 }
 0x151   : > { %v637_v50 = vpop.f32.mrf.mxu0  ;;  %2744 = vmatmul.mubr.bf16.vlgmr.msra.gmra.mxu1 %v698_v45 }
 0x152   : > { %v638_v51 = vadd.f32 %v2149_v31, %v637_v50  ;;  %2863 = vmatpush3.bf16.msra.mxu1 %v3015_v24  ;;  %v688_v52 = vmax.f32 %v646_v48, 0.0  ;;  %v3022_v24 = vld [vmem:[#allocation13] sm:$0xff]  }
 0x153   : > { %v2721_v53 = vpop.f32.mrf.mxu0  ;;  %2856 = vmatprep.subr.bf16.mxu1 %v3016_v25  ;;  %2773 = vmatprep.subr.bf16.mxu0 %v3022_v24 }
 0x154   : > { %v686_v55 = vmax.f32 %v638_v51, 0.0  ;;  %v700_v59 = vpack.c.bf16 %v688_v52, %v687_v56  ;;  %v659_v63 = vadd.f32 %v2721_v53, %v2149_v31  ;;  %2774 = vmatpush3.bf16.msra.mxu0 %v3022_v24 }
 0x155   : > { %v650_v57 = vpop.f32.mrf.mxu0 }
 0x156   : > { %v699_v58 = vpack.c.bf16 %v686_v55, %v685_v54  ;;  %2864 = vmatpush3.bf16.msra.mxu1 %v3016_v25  ;;  %v651_v61 = vadd.f32 %v2149_v31, %v650_v57  ;;  %v691_v6 = vmax.f32 %v659_v63, 0.0 }
 0x157   : > { %v2722_v60 = vpop.f32.mrf.mxu0  ;;  %2857 = vmatprep.subr.bf16.mxu1 %v3017_v26 }
 0x158   : > { %v662_v62 = vadd.f32 %v2722_v60, %v2149_v31  ;;  %2747 = vmatprep.mubr.bf16.mxu1 %v699_v58  ;;  %v689_v4 = vmax.f32 %v651_v61, 0.0 }
 0x159   : > { %v653_v0 = vpop.f32.mrf.mxu0  ;;  %2748 = vmatmul.mubr.bf16.gmra.mxu1 %v700_v59 }
 0x15a   : > { %v654_v1 = vadd.f32 %v2149_v31, %v653_v0  ;;  %2865 = vmatpush3.bf16.msra.mxu1 %v3017_v26  ;;  %v692_v2 = vmax.f32 %v662_v62, 0.0 }
 0x15b   : > { %v2725_v3 = vpop.f32.mrf.mxu0  ;;  %2858 = vmatprep.subr.bf16.mxu1 %v3018_v27 }
 0x15c   : > { %v690_v5 = vmax.f32 %v654_v1, 0.0  ;;  %v702_v9 = vpack.c.bf16 %v692_v2, %v691_v6  ;;  %v675_v13 = vadd.f32 %v2725_v3, %v2149_v31 }
 0x15d   : > { %v666_v7 = vpop.f32.mrf.mxu0 }
 0x15e   : > { %v701_v8 = vpack.c.bf16 %v690_v5, %v689_v4  ;;  %2866 = vmatpush3.bf16.msra.mxu1 %v3018_v27  ;;  %v667_v11 = vadd.f32 %v2149_v31, %v666_v7  ;;  %v695_v19 = vmax.f32 %v675_v13, 0.0  ;;  %v2166_v27 = vld [vmem:[%s3503_s5] ss:$0 sm:$0xff] }
 0x15f   : > { %v2726_v10 = vpop.f32.mrf.mxu0  ;;  %2859 = vmatprep.subr.bf16.mxu1 %v3432_v28 }
 0x160   : > { %v678_v12 = vadd.f32 %v2726_v10, %v2149_v31  ;;  %2751 = vmatprep.mubr.bf16.mxu1 %v701_v8  ;;  %v693_v17 = vmax.f32 %v667_v11, 0.0 }
 0x161   : > { %v669_v14 = vpop.f32.mrf.mxu0  ;;  %2752 = vmatmul.mubr.bf16.gmra.mxu1 %v702_v9 }
 0x162   : > { %v670_v15 = vadd.f32 %v2149_v31, %v669_v14  ;;  %2867 = vmatpush3.bf16.msra.mxu1 %v3432_v28  ;;  %v696_v16 = vmax.f32 %v678_v12, 0.0 }
 0x163   : > { %2860 = vmatprep.subr.bf16.mxu1 %v3020_v22 }
 0x164   : > { %v694_v18 = vmax.f32 %v670_v15, 0.0  ;;  %v704_v21 = vpack.c.bf16 %v696_v16, %v695_v19 }
 0x166   : > { %v703_v20 = vpack.c.bf16 %v694_v18, %v693_v17  ;;  %2868 = vmatpush3.bf16.msra.mxu1 %v3020_v22  ;;  %v3447_v18 = vld [vmem:[%s3505_s7] ss:$0 sm:$0xff] }
 0x167   : > { %2861 = vmatprep.subr.bf16.mxu1 %v3021_v23 }
 0x168   : > { %2755 = vmatprep.mubr.bf16.mxu1 %v703_v20 }
 0x169   : > { %2756 = vmatmul.mubr.bf16.gmra.mxu1 %v704_v21 }
 0x16a   : > { %2869 = vmatpush3.bf16.msra.mxu1 %v3021_v23 }
 0x16b   : > { %2862 = vmatprep.subr.bf16.mxu1 %v3022_v24 }
 0x16e   : > { %2870 = vmatpush3.bf16.msra.mxu1 %v3022_v24 }
 0x211   : > { %v2745_v25 = vpop.f32.mrf.mxu1 }
 0x212   : > { %v819_v31 = vadd.f32 %v2745_v25, %v2166_v27 }
 0x213   : > { %v810_v26 = vpop.f32.mrf.mxu1 }
 0x214   : > { %v811_v29 = vadd.f32 %v2166_v27, %v810_v26  ;;  %v875_v38 = vmax.f32 %v819_v31, 0.0 }
 0x215   : > { %v2746_v28 = vpop.f32.mrf.mxu1 }
 0x216   : > { %v822_v30 = vadd.f32 %v2746_v28, %v2166_v27  ;;  %v873_v36 = vmax.f32 %v811_v29, 0.0 }
 0x217   : > { %v813_v32 = vpop.f32.mrf.mxu1 }
 0x218   : > { %v814_v33 = vadd.f32 %v2166_v27, %v813_v32  ;;  %v876_v34 = vmax.f32 %v822_v30, 0.0 }
 0x219   : > { %v2749_v35 = vpop.f32.mrf.mxu1 }
 0x21a   : > { %v874_v37 = vmax.f32 %v814_v33, 0.0  ;;  %v890_v41 = vpack.c.bf16 %v876_v34, %v875_v38  ;;  %v835_v45 = vadd.f32 %v2749_v35, %v2166_v27 }
 0x21b   : > { %v826_v39 = vpop.f32.mrf.mxu1 }
 0x21c   : > { %v889_v40 = vpack.c.bf16 %v874_v37, %v873_v36  ;;  %v827_v43 = vadd.f32 %v2166_v27, %v826_v39  ;;  %v879_v52 = vmax.f32 %v835_v45, 0.0 }
 0x21d   : > { %v2750_v42 = vpop.f32.mrf.mxu1 }
 0x21e   : > { %v838_v44 = vadd.f32 %v2750_v42, %v2166_v27  ;;  %2775 = vmatprep.mubr.bf16.mxu0 %v889_v40  ;;  %v877_v50 = vmax.f32 %v827_v43, 0.0 }
 0x21f   : > { %v829_v46 = vpop.f32.mrf.mxu1  ;;  %2776 = vmatmul.mubr.bf16.vlgmr.msra.gmra.mxu0 %v890_v41 }
 0x220   : > { %v830_v47 = vadd.f32 %v2166_v27, %v829_v46  ;;  %v880_v48 = vmax.f32 %v838_v44, 0.0 }
 0x221   : > { %v2753_v49 = vpop.f32.mrf.mxu1 }
 0x222   : > { %v878_v51 = vmax.f32 %v830_v47, 0.0  ;;  %v892_v55 = vpack.c.bf16 %v880_v48, %v879_v52  ;;  %v851_v59 = vadd.f32 %v2753_v49, %v2166_v27 }
 0x223   : > { %v842_v53 = vpop.f32.mrf.mxu1 }
 0x224   : > { %v891_v54 = vpack.c.bf16 %v878_v51, %v877_v50  ;;  %v843_v57 = vadd.f32 %v2166_v27, %v842_v53  ;;  %v883_v2 = vmax.f32 %v851_v59, 0.0 }
 0x225   : > { %v2754_v56 = vpop.f32.mrf.mxu1 }
 0x226   : > { %v854_v58 = vadd.f32 %v2754_v56, %v2166_v27  ;;  %2779 = vmatprep.mubr.bf16.mxu0 %v891_v54  ;;  %v881_v0 = vmax.f32 %v843_v57, 0.0 }
 0x227   : > { %v845_v60 = vpop.f32.mrf.mxu1  ;;  %2780 = vmatmul.mubr.bf16.gmra.mxu0 %v892_v55 }
 0x228   : > { %v846_v61 = vadd.f32 %v2166_v27, %v845_v60  ;;  %v884_v62 = vmax.f32 %v854_v58, 0.0 }
 0x229   : > { %v2757_v63 = vpop.f32.mrf.mxu1 }
 0x22a   : > { %v882_v1 = vmax.f32 %v846_v61, 0.0  ;;  %v894_v5 = vpack.c.bf16 %v884_v62, %v883_v2  ;;  %v867_v9 = vadd.f32 %v2757_v63, %v2166_v27 }
 0x22b   : > { %v858_v3 = vpop.f32.mrf.mxu1 }
 0x22c   : > { %v893_v4 = vpack.c.bf16 %v882_v1, %v881_v0  ;;  %v859_v7 = vadd.f32 %v2166_v27, %v858_v3  ;;  %v887_v15 = vmax.f32 %v867_v9, 0.0 }
 0x22d   : > { %v2758_v6 = vpop.f32.mrf.mxu1 }
 0x22e   : > { %v870_v8 = vadd.f32 %v2758_v6, %v2166_v27  ;;  %2783 = vmatprep.mubr.bf16.mxu1 %v893_v4  ;;  %v885_v13 = vmax.f32 %v859_v7, 0.0 }
 0x22f   : > { %v861_v10 = vpop.f32.mrf.mxu1  ;;  %2784 = vmatmul.mubr.bf16.vlgmr.msra.gmra.mxu1 %v894_v5 }
 0x230   : > { %v862_v11 = vadd.f32 %v2166_v27, %v861_v10  ;;  %v888_v12 = vmax.f32 %v870_v8, 0.0 }
 0x232   : > { %v886_v14 = vmax.f32 %v862_v11, 0.0  ;;  %v896_v17 = vpack.c.bf16 %v888_v12, %v887_v15 }
 0x234   : > { %v895_v16 = vpack.c.bf16 %v886_v14, %v885_v13 }
 0x236   : > { %2787 = vmatprep.mubr.bf16.mxu1 %v895_v16 }
 0x237   : > { %2788 = vmatmul.mubr.bf16.gmra.mxu1 %v896_v17 }
 0x2df   : > { %v2777_v19 = vpop.f32.mrf.mxu0 }
 0x2e0   : > { %v1011_v20 = vadd.f32 %v2777_v19, %v3447_v18 }
 0x2e1   : > { %v1002_v21 = vpop.f32.mrf.mxu0 }
 0x2e2   : > { %1249 = vst [vmem:[#allocation14 + $0x10] sm:$0xff] %v1011_v20  ;;  %v1003_v22 = vadd.f32 %v3447_v18, %v1002_v21  ;;  %v1151_v26 = vmul.f32 0.1, %v1011_v20 }
 0x2e3   : > { %v2778_v23 = vpop.f32.mrf.mxu0 }
 0x2e4   : > { %1247 = vst [vmem:[#allocation14] sm:$0xff] %v1003_v22  ;;  %v1014_v24 = vadd.f32 %v2778_v23, %v3447_v18  ;;  %v1149_v30 = vmul.f32 0.1, %v1003_v22 }
 0x2e5   : > { %v1005_v25 = vpop.f32.mrf.mxu0 }
 0x2e6   : > { %v2357_v27 = vpack.c.bf16 %v1014_v24, %v1011_v20  ;;  %v1152_v28 = vmul.f32 0.1, %v1014_v24  ;;  %1250 = vst [vmem:[#allocation14 + $0x18] sm:$0xff] %v1014_v24  ;;  %v1006_v29 = vadd.f32 %v3447_v18, %v1005_v25 }
 0x2e7   : > { %v2781_v31 = vpop.f32.mrf.mxu0 }
 0x2e8   : > { %2573 = vst [vmem:[#allocation2 + $0x8] sm:$0xff] %v2357_v27   ;;  %v2397_v32 = vpack.c.bf16 %v1152_v28, %v1151_v26  ;;  %v2352_v33 = vpack.c.bf16 %v1006_v29, %v1003_v22  ;;  %v1150_v34 = vmul.f32 0.1, %v1006_v29  ;;  %1248 = vst [vmem:[#allocation14 + $0x8] sm:$0xff] %v1006_v29  ;;  %v1027_v35 = vadd.f32 %v2781_v31, %v3447_v18 }
 0x2e9   : > { %v1018_v36 = vpop.f32.mrf.mxu0 }
 0x2ea   : > { %2580 = vst [vmem:[#allocation4] sm:$0xff] %v2397_v32   ;;  %2353 = vst [vmem:[#allocation2] sm:$0xff] %v2352_v33   ;;  %v2392_v37 = vpack.c.bf16 %v1150_v34, %v1149_v30  ;;  %v1019_v38 = vadd.f32 %v3447_v18, %v1018_v36  ;;  %v1155_v42 = vmul.f32 0.1, %v1027_v35 }
 0x2eb   : > { %1253 = vst [vmem:[#allocation14 + $0x30] sm:$0xff] %v1027_v35  ;;  %v2782_v39 = vpop.f32.mrf.mxu0 }
 0x2ec   : > { %2393 = vst [vmem:[#allocation4 + $0x30] sm:$0xff] %v2392_v37   ;;  %1251 = vst [vmem:[#allocation14 + $0x20] sm:$0xff] %v1019_v38  ;;  %v1030_v40 = vadd.f32 %v2782_v39, %v3447_v18  ;;  %v1153_v46 = vmul.f32 0.1, %v1019_v38 }
 0x2ed   : > { %v1021_v41 = vpop.f32.mrf.mxu0 }
 0x2ee   : > { %v2367_v43 = vpack.c.bf16 %v1030_v40, %v1027_v35  ;;  %v1156_v44 = vmul.f32 0.1, %v1030_v40  ;;  %1254 = vst [vmem:[#allocation14 + $0x38] sm:$0xff] %v1030_v40  ;;  %v1022_v45 = vadd.f32 %v3447_v18, %v1021_v41 }
 0x2ef   : > { %v2785_v47 = vpop.f32.mrf.mxu1 }
 0x2f0   : > { %2575 = vst [vmem:[#allocation2 + $0x18] sm:$0xff] %v2367_v43   ;;  %v2407_v48 = vpack.c.bf16 %v1156_v44, %v1155_v42  ;;  %v2362_v49 = vpack.c.bf16 %v1022_v45, %v1019_v38  ;;  %v1154_v50 = vmul.f32 0.1, %v1022_v45  ;;  %1252 = vst [vmem:[#allocation14 + $0x28] sm:$0xff] %v1022_v45  ;;  %v1043_v51 = vadd.f32 %v2785_v47, %v3447_v18 }
 0x2f1   : > { %v1034_v52 = vpop.f32.mrf.mxu1 }
 0x2f2   : > { %2582 = vst [vmem:[#allocation4 + $0x10] sm:$0xff] %v2407_v48   ;;  %2574 = vst [vmem:[#allocation2 + $0x10] sm:$0xff] %v2362_v49   ;;  %v2402_v53 = vpack.c.bf16 %v1154_v50, %v1153_v46  ;;  %v1035_v54 = vadd.f32 %v3447_v18, %v1034_v52  ;;  %v1159_v58 = vmul.f32 0.1, %v1043_v51 }
 0x2f3   : > { %1257 = vst [vmem:[#allocation14 + $0x50] sm:$0xff] %v1043_v51  ;;  %v2786_v55 = vpop.f32.mrf.mxu1 }
 0x2f4   : > { %2581 = vst [vmem:[#allocation4 + $0x18] sm:$0xff] %v2402_v53   ;;  %1255 = vst [vmem:[#allocation14 + $0x40] sm:$0xff] %v1035_v54  ;;  %v1046_v56 = vadd.f32 %v2786_v55, %v3447_v18  ;;  %v1157_v62 = vmul.f32 0.1, %v1035_v54 }
 0x2f5   : > { %v1037_v57 = vpop.f32.mrf.mxu1 }
 0x2f6   : > { %v2377_v59 = vpack.c.bf16 %v1046_v56, %v1043_v51  ;;  %v1160_v60 = vmul.f32 0.1, %v1046_v56  ;;  %1258 = vst [vmem:[#allocation14 + $0x58] sm:$0xff] %v1046_v56  ;;  %v1038_v61 = vadd.f32 %v3447_v18, %v1037_v57 }
 0x2f7   : > { %v2789_v63 = vpop.f32.mrf.mxu1 }
 0x2f8   : > { %2577 = vst [vmem:[#allocation2 + $0x28] sm:$0xff] %v2377_v59   ;;  %v2417_v0 = vpack.c.bf16 %v1160_v60, %v1159_v58  ;;  %v2372_v1 = vpack.c.bf16 %v1038_v61, %v1035_v54  ;;  %v1158_v2 = vmul.f32 0.1, %v1038_v61  ;;  %1256 = vst [vmem:[#allocation14 + $0x48] sm:$0xff] %v1038_v61  ;;  %v1059_v3 = vadd.f32 %v2789_v63, %v3447_v18 }
 0x2f9   : > { %v1050_v4 = vpop.f32.mrf.mxu1 }
 0x2fa   : > { %2584 = vst [vmem:[#allocation4 + $0x20] sm:$0xff] %v2417_v0   ;;  %2576 = vst [vmem:[#allocation2 + $0x20] sm:$0xff] %v2372_v1   ;;  %v2412_v5 = vpack.c.bf16 %v1158_v2, %v1157_v62  ;;  %v1051_v6 = vadd.f32 %v3447_v18, %v1050_v4  ;;  %v1163_v10 = vmul.f32 0.1, %v1059_v3 }
 0x2fb   : > { %1261 = vst [vmem:[#allocation14 + $0x70] sm:$0xff] %v1059_v3  ;;  %v2790_v7 = vpop.f32.mrf.mxu1 }
 0x2fc   : > { %2583 = vst [vmem:[#allocation4 + $0x8] sm:$0xff] %v2412_v5   ;;  %1259 = vst [vmem:[#allocation14 + $0x60] sm:$0xff] %v1051_v6  ;;  %v1062_v8 = vadd.f32 %v2790_v7, %v3447_v18  ;;  %v1161_v14 = vmul.f32 0.1, %v1051_v6 }
 0x2fd   : > { %v1053_v9 = vpop.f32.mrf.mxu1 }
 0x2fe   : > { %v2387_v11 = vpack.c.bf16 %v1062_v8, %v1059_v3  ;;  %v1164_v12 = vmul.f32 0.1, %v1062_v8  ;;  %1262 = vst [vmem:[#allocation14 + $0x78] sm:$0xff] %v1062_v8  ;;  %v1054_v13 = vadd.f32 %v3447_v18, %v1053_v9 }
 0x300   : > { %2579 = vst [vmem:[#allocation2 + $0x38] sm:$0xff] %v2387_v11   ;;  %v2427_v15 = vpack.c.bf16 %v1164_v12, %v1163_v10  ;;  %v2382_v16 = vpack.c.bf16 %v1054_v13, %v1051_v6  ;;  %v1162_v17 = vmul.f32 0.1, %v1054_v13  ;;  %1260 = vst [vmem:[#allocation14 + $0x68] sm:$0xff] %v1054_v13 }
 0x302   : > { %2586 = vst [vmem:[#allocation4 + $0x38] sm:$0xff] %v2427_v15   ;;  %2578 = vst [vmem:[#allocation2 + $0x30] sm:$0xff] %v2382_v16   ;;  %v2422_v19 = vpack.c.bf16 %v1162_v17, %v1161_v14 }
 0x304   : > { %2585 = vst [vmem:[#allocation4 + $0x28] sm:$0xff] %v2422_v19  }
 0x305 PF: > { %p1263_p4 = scmp.lt.s32.totalorder %s3243_s27, 0  ;;  %s1264_s21 = ssub.s32 0, %s3243_s27 }
 0x306   : > { %s2216_s22 = smin.u32 %s3243_s27, %s1264_s21  ;;  %p1269_p11 = scmp.gt.s32.totalorder %s3243_s27, 0 }
 0x307   : > { %s1266_s23 = sand.u32 1, %s2216_s22  }
 0x308   : > { %s1267_s24 = ssub.s32 0, %s1266_s23 }
 0x309   : > { %s3515_s24 = smov (!%p1263_p4, %s1267_s24), %s1266_s23 }
 0x30a   : > { %p1270_p7 = scmp.eq.s32.totalorder %s3515_s24, 1 }
 0x30c   : > { %p1271_p12 = pnand %p1270_p7, %p1269_p11 }
 0x30e   : > { %1274 = sbr.rel (%p1271_p12) target bundleno = 1033 (0x409), region = 80 }
 0x313   : > { %v3023_v18 = vld [vmem:[#allocation2 + $0x38] sm:$0xff]   ;;  %v3024_v20 = vld [vmem:[#allocation2 + $0x30] sm:$0xff]   ;;  %v3025_v21 = vld [vmem:[#allocation2 + $0x28] sm:$0xff]  }
 0x314   : > { %2791 = vmatprep.subr.bf16.mxu0 %v3023_v18  ;;  %2871 = vmatprep.subr.bf16.mxu1 %v3023_v18  ;;  %v3026_v22 = vld [vmem:[#allocation2 + $0x20] sm:$0xff]   ;;  %v3027_v25 = vld [vmem:[#allocation2 + $0x18] sm:$0xff]   ;;  %v3028_v26 = vld [vmem:[#allocation2 + $0x10] sm:$0xff]  }
 0x315   : > { %2792 = vmatpush3.bf16.msra.mxu0 %v3023_v18  ;;  %2879 = vmatpush3.bf16.msra.mxu1 %v3023_v18  ;;  %v3031_v23 = vld [vmem:[#allocation8] sm:$0xff]   ;;  %v3029_v27 = vld [vmem:[#allocation2 + $0x8] sm:$0xff]   ;;  %v3035_v31 = vld [vmem:[#allocation8 + $0x10] sm:$0xff]  }
 0x316   : > { %2793 = vmatprep.subr.bf16.mxu0 %v3024_v20  ;;  %2872 = vmatprep.subr.bf16.mxu1 %v3024_v20  ;;  %v3032_v24 = vld [vmem:[#allocation8 + $0x20] sm:$0xff]   ;;  %v3033_v29 = vld [vmem:[#allocation8 + $0x8] sm:$0xff]   ;;  %v3036_v32 = vld [vmem:[#allocation8 + $0x30] sm:$0xff]  }
 0x317   : > { %2807 = vmatprep.mubr.bf16.mxu0 %v3031_v23  ;;  %2815 = vmatprep.mubr.bf16.mxu1 %v3032_v24  ;;  %v3030_v28 = vld [vmem:[#allocation2] sm:$0xff]   ;;  %v3034_v30 = vld [vmem:[#allocation8 + $0x28] sm:$0xff]   ;;  %v3037_v33 = vld [vmem:[#allocation8 + $0x18] sm:$0xff]  }
 0x318   : > { %v3038_v34 = vld [vmem:[#allocation8 + $0x38] sm:$0xff]   ;;  %v2587_v35 = vld [vmem:[#allocation4] sm:$0xff]   ;;  %v2430_v37 = vld [vmem:[#allocation4 + $0x30] sm:$0xff]  }
 0x319   : > { %2794 = vmatpush3.bf16.msra.mxu0 %v3024_v20  ;;  %2880 = vmatpush3.bf16.msra.mxu1 %v3024_v20  ;;  %v2591_v36 = vld [vmem:[#allocation4 + $0x20] sm:$0xff]   ;;  %v2590_v38 = vld [vmem:[#allocation4 + $0x8] sm:$0xff]   ;;  %v2435_v39 = vunpack.c.l.bf16 %v2587_v35  ;;  %v2431_v41 = vunpack.c.l.bf16 %v2430_v37  ;;  %v2436_v47 = vunpack.c.h.bf16 %v2587_v35  ;;  %v2589_v51 = vld [vmem:[#allocation4 + $0x10] sm:$0xff]   ;;  %v2432_v55 = vunpack.c.h.bf16 %v2430_v37 }
 0x31a   : > { %2795 = vmatprep.subr.bf16.mxu0 %v3025_v21  ;;  %2873 = vmatprep.subr.bf16.mxu1 %v3025_v21  ;;  %v2451_v40 = vunpack.c.l.bf16 %v2591_v36  ;;  %v2447_v42 = vunpack.c.l.bf16 %v2590_v38  ;;  %v2452_v48 = vunpack.c.h.bf16 %v2591_v36  ;;  %v2593_v52 = vld [vmem:[#allocation4 + $0x38] sm:$0xff]   ;;  %v2448_v56 = vunpack.c.h.bf16 %v2590_v38  ;;  %v2592_v58 = vld [vmem:[#allocation4 + $0x28] sm:$0xff]  }
 0x31b   : > { %v2588_v57 = vld [vmem:[#allocation4 + $0x18] sm:$0xff]   ;;  %v2443_v63 = vunpack.c.l.bf16 %v2589_v51  ;;  %v2459_v0 = vunpack.c.l.bf16 %v2593_v52  ;;  %v2455_v4 = vunpack.c.l.bf16 %v2592_v58  ;;  %v2444_v11 = vunpack.c.h.bf16 %v2589_v51 }
 0x31c   : > { %v2439_v3 = vunpack.c.l.bf16 %v2588_v57  ;;  %v2460_v12 = vunpack.c.h.bf16 %v2593_v52 }
 0x31d   : > { %2796 = vmatpush3.bf16.msra.mxu0 %v3025_v21  ;;  %2881 = vmatpush3.bf16.msra.mxu1 %v3025_v21  ;;  %v2440_v21 = vunpack.c.h.bf16 %v2588_v57 }
 0x31e   : > { %2797 = vmatprep.subr.bf16.mxu0 %v3026_v22  ;;  %2874 = vmatprep.subr.bf16.mxu1 %v3026_v22 }
 0x321   : > { %2798 = vmatpush3.bf16.msra.mxu0 %v3026_v22  ;;  %2882 = vmatpush3.bf16.msra.mxu1 %v3026_v22  ;;  %v2456_v22 = vunpack.c.h.bf16 %v2592_v58 }
 0x322   : > { %2799 = vmatprep.subr.bf16.mxu0 %v3027_v25  ;;  %2875 = vmatprep.subr.bf16.mxu1 %v3027_v25 }
 0x325   : > { %2800 = vmatpush3.bf16.msra.mxu0 %v3027_v25  ;;  %2883 = vmatpush3.bf16.msra.mxu1 %v3027_v25 }
 0x326   : > { %2801 = vmatprep.subr.bf16.mxu0 %v3028_v26  ;;  %2876 = vmatprep.subr.bf16.mxu1 %v3028_v26 }
 0x329   : > { %2802 = vmatpush3.bf16.msra.mxu0 %v3028_v26  ;;  %2884 = vmatpush3.bf16.msra.mxu1 %v3028_v26 }
 0x32a   : > { %2803 = vmatprep.subr.bf16.mxu0 %v3029_v27  ;;  %2877 = vmatprep.subr.bf16.mxu1 %v3029_v27 }
 0x32d   : > { %2804 = vmatpush3.bf16.msra.mxu0 %v3029_v27  ;;  %2885 = vmatpush3.bf16.msra.mxu1 %v3029_v27 }
 0x32e   : > { %2805 = vmatprep.subr.bf16.mxu0 %v3030_v28  ;;  %2878 = vmatprep.subr.bf16.mxu1 %v3030_v28 }
 0x331   : > { %2806 = vmatpush3.bf16.msra.mxu0 %v3030_v28  ;;  %2886 = vmatpush3.bf16.msra.mxu1 %v3030_v28 }
 0x334   : > { %2808 = vmatmul.mubr.bf16.vlgmr.msra.gmra.mxu0 %v3033_v29  ;;  %2816 = vmatmul.mubr.bf16.vlgmr.msra.gmra.mxu1 %v3034_v30 }
 0x335   : > { %2811 = vmatprep.mubr.bf16.mxu0 %v3035_v31  ;;  %2819 = vmatprep.mubr.bf16.mxu1 %v3036_v32 }
 0x33c   : > { %2812 = vmatmul.mubr.bf16.gmra.mxu0 %v3037_v33  ;;  %2820 = vmatmul.mubr.bf16.gmra.mxu1 %v3038_v34 }
 0x3f4   : > { %v2809_v43 = vpop.f32.mrf.mxu0  ;;  %v2817_v44 = vpop.f32.mrf.mxu1 }
 0x3f5   : > { %v1482_v45 = vadd.f32 %v2809_v43, %v2435_v39  ;;  %v1514_v46 = vadd.f32 %v2817_v44, %v2451_v40 }
 0x3f6   : > { %v1473_v49 = vpop.f32.mrf.mxu0  ;;  %v1505_v50 = vpop.f32.mrf.mxu1 }
 0x3f7   : > { %1620 = vst [vmem:[#allocation14 + $0x10] sm:$0xff] %v1482_v45  ;;  %1628 = vst [vmem:[#allocation14 + $0x50] sm:$0xff] %v1514_v46  ;;  %v1474_v53 = vadd.f32 %v2431_v41, %v1473_v49  ;;  %v1506_v54 = vadd.f32 %v2447_v42, %v1505_v50 }
 0x3f8   : > { %v2810_v59 = vpop.f32.mrf.mxu0  ;;  %v2818_v60 = vpop.f32.mrf.mxu1 }
 0x3f9   : > { %1618 = vst [vmem:[#allocation14] sm:$0xff] %v1474_v53  ;;  %1626 = vst [vmem:[#allocation14 + $0x40] sm:$0xff] %v1506_v54  ;;  %v1485_v61 = vadd.f32 %v2810_v59, %v2436_v47  ;;  %v1517_v62 = vadd.f32 %v2818_v60, %v2452_v48 }
 0x3fa   : > { %v1476_v1 = vpop.f32.mrf.mxu0  ;;  %v1508_v2 = vpop.f32.mrf.mxu1 }
 0x3fb   : > { %v2469_v5 = vpack.c.bf16 %v1485_v61, %v1482_v45  ;;  %1621 = vst [vmem:[#allocation14 + $0x18] sm:$0xff] %v1485_v61  ;;  %v2489_v6 = vpack.c.bf16 %v1517_v62, %v1514_v46  ;;  %1629 = vst [vmem:[#allocation14 + $0x58] sm:$0xff] %v1517_v62  ;;  %v1477_v7 = vadd.f32 %v2432_v55, %v1476_v1 }
 0x3fc   : > { %v1509_v8 = vadd.f32 %v2448_v56, %v1508_v2  ;;  %v2813_v9 = vpop.f32.mrf.mxu0  ;;  %v2821_v10 = vpop.f32.mrf.mxu1 }
 0x3fd   : > { %2594 = vst [vmem:[#allocation3 + $0x8] sm:$0xff] %v2469_v5   ;;  %2598 = vst [vmem:[#allocation3 + $0x28] sm:$0xff] %v2489_v6   ;;  %v2464_v13 = vpack.c.bf16 %v1477_v7, %v1474_v53  ;;  %v1498_v15 = vadd.f32 %v2813_v9, %v2443_v63  ;;  %v1530_v16 = vadd.f32 %v2821_v10, %v2459_v0 }
 0x3fe   : > { %1619 = vst [vmem:[#allocation14 + $0x8] sm:$0xff] %v1477_v7  ;;  %v2484_v14 = vpack.c.bf16 %v1509_v8, %v1506_v54  ;;  %1627 = vst [vmem:[#allocation14 + $0x48] sm:$0xff] %v1509_v8  ;;  %v1489_v17 = vpop.f32.mrf.mxu0  ;;  %v1521_v19 = vpop.f32.mrf.mxu1 }
 0x3ff   : > { %2465 = vst [vmem:[#allocation3] sm:$0xff] %v2464_v13   ;;  %1624 = vst [vmem:[#allocation14 + $0x30] sm:$0xff] %v1498_v15  ;;  %v1490_v18 = vadd.f32 %v2439_v3, %v1489_v17  ;;  %v1522_v20 = vadd.f32 %v2455_v4, %v1521_v19 }
 0x400   : > { %2597 = vst [vmem:[#allocation3 + $0x20] sm:$0xff] %v2484_v14   ;;  %1632 = vst [vmem:[#allocation14 + $0x70] sm:$0xff] %v1530_v16  ;;  %v2814_v23 = vpop.f32.mrf.mxu0  ;;  %v2822_v24 = vpop.f32.mrf.mxu1 }
 0x401   : > { %1622 = vst [vmem:[#allocation14 + $0x20] sm:$0xff] %v1490_v18  ;;  %1630 = vst [vmem:[#allocation14 + $0x60] sm:$0xff] %v1522_v20  ;;  %v1501_v25 = vadd.f32 %v2814_v23, %v2444_v11  ;;  %v1533_v26 = vadd.f32 %v2822_v24, %v2460_v12 }
 0x402   : > { %v1492_v27 = vpop.f32.mrf.mxu0  ;;  %v1524_v28 = vpop.f32.mrf.mxu1 }
 0x403   : > { %v2479_v29 = vpack.c.bf16 %v1501_v25, %v1498_v15  ;;  %1625 = vst [vmem:[#allocation14 + $0x38] sm:$0xff] %v1501_v25  ;;  %v2499_v30 = vpack.c.bf16 %v1533_v26, %v1530_v16  ;;  %1633 = vst [vmem:[#allocation14 + $0x78] sm:$0xff] %v1533_v26  ;;  %v1493_v31 = vadd.f32 %v2440_v21, %v1492_v27 }
 0x404   : > { %v1525_v32 = vadd.f32 %v2456_v22, %v1524_v28 }
 0x405   : > { %2596 = vst [vmem:[#allocation3 + $0x18] sm:$0xff] %v2479_v29   ;;  %2600 = vst [vmem:[#allocation3 + $0x38] sm:$0xff] %v2499_v30   ;;  %v2474_v33 = vpack.c.bf16 %v1493_v31, %v1490_v18 }
 0x406   : > { %1623 = vst [vmem:[#allocation14 + $0x28] sm:$0xff] %v1493_v31  ;;  %v2494_v34 = vpack.c.bf16 %v1525_v32, %v1522_v20  ;;  %1631 = vst [vmem:[#allocation14 + $0x68] sm:$0xff] %v1525_v32 }
 0x407   : > { %2595 = vst [vmem:[#allocation3 + $0x10] sm:$0xff] %v2474_v33  }
 0x408   : > { %2599 = vst [vmem:[#allocation3 + $0x30] sm:$0xff] %v2494_v34  }
 0x409 PF: > { %p1634_p13 = scmp.eq.s32.totalorder %s3515_s24, 0 }
 0x40b   : > { %p1635_p5 = pnand %p1634_p13, %p1269_p11 }
 0x40d   : > { %1638 = sbr.rel (%p1635_p5) target bundleno = 1288 (0x508), region = 84 }
 0x412   : > { %v3039_v35 = vld [vmem:[#allocation3 + $0x38] sm:$0xff]   ;;  %v3040_v36 = vld [vmem:[#allocation3 + $0x30] sm:$0xff]   ;;  %v3041_v37 = vld [vmem:[#allocation3 + $0x28] sm:$0xff]  }
 0x413   : > { %2823 = vmatprep.subr.bf16.mxu0 %v3039_v35  ;;  %2887 = vmatprep.subr.bf16.mxu1 %v3039_v35  ;;  %v3042_v38 = vld [vmem:[#allocation3 + $0x20] sm:$0xff]   ;;  %v3043_v41 = vld [vmem:[#allocation3 + $0x18] sm:$0xff]   ;;  %v3044_v42 = vld [vmem:[#allocation3 + $0x10] sm:$0xff]  }
 0x414   : > { %2824 = vmatpush3.bf16.msra.mxu0 %v3039_v35  ;;  %2895 = vmatpush3.bf16.msra.mxu1 %v3039_v35  ;;  %v3047_v39 = vld [vmem:[#allocation8] sm:$0xff]   ;;  %v3045_v43 = vld [vmem:[#allocation3 + $0x8] sm:$0xff]   ;;  %v3051_v47 = vld [vmem:[#allocation8 + $0x10] sm:$0xff]  }
 0x415   : > { %2825 = vmatprep.subr.bf16.mxu0 %v3040_v36  ;;  %2888 = vmatprep.subr.bf16.mxu1 %v3040_v36  ;;  %v3048_v40 = vld [vmem:[#allocation8 + $0x20] sm:$0xff]   ;;  %v3049_v45 = vld [vmem:[#allocation8 + $0x8] sm:$0xff]   ;;  %v3052_v48 = vld [vmem:[#allocation8 + $0x30] sm:$0xff]  }
 0x416   : > { %2839 = vmatprep.mubr.bf16.mxu0 %v3047_v39  ;;  %2847 = vmatprep.mubr.bf16.mxu1 %v3048_v40  ;;  %v3046_v44 = vld [vmem:[#allocation3] sm:$0xff]   ;;  %v3050_v46 = vld [vmem:[#allocation8 + $0x28] sm:$0xff]   ;;  %v3053_v49 = vld [vmem:[#allocation8 + $0x18] sm:$0xff]  }
 0x417   : > { %v3054_v50 = vld [vmem:[#allocation8 + $0x38] sm:$0xff]   ;;  %v2601_v51 = vld [vmem:[#allocation4] sm:$0xff]   ;;  %v2502_v53 = vld [vmem:[#allocation4 + $0x30] sm:$0xff]  }
 0x418   : > { %2826 = vmatpush3.bf16.msra.mxu0 %v3040_v36  ;;  %2896 = vmatpush3.bf16.msra.mxu1 %v3040_v36  ;;  %v2605_v52 = vld [vmem:[#allocation4 + $0x20] sm:$0xff]   ;;  %v2604_v54 = vld [vmem:[#allocation4 + $0x8] sm:$0xff]   ;;  %v2507_v55 = vunpack.c.l.bf16 %v2601_v51  ;;  %v2503_v57 = vunpack.c.l.bf16 %v2502_v53  ;;  %v2508_v63 = vunpack.c.h.bf16 %v2601_v51  ;;  %v2603_v3 = vld [vmem:[#allocation4 + $0x10] sm:$0xff]   ;;  %v2504_v7 = vunpack.c.h.bf16 %v2502_v53 }
 0x419   : > { %2827 = vmatprep.subr.bf16.mxu0 %v3041_v37  ;;  %2889 = vmatprep.subr.bf16.mxu1 %v3041_v37  ;;  %v2523_v56 = vunpack.c.l.bf16 %v2605_v52  ;;  %v2519_v58 = vunpack.c.l.bf16 %v2604_v54  ;;  %v2524_v0 = vunpack.c.h.bf16 %v2605_v52  ;;  %v2607_v4 = vld [vmem:[#allocation4 + $0x38] sm:$0xff]   ;;  %v2520_v8 = vunpack.c.h.bf16 %v2604_v54  ;;  %v2606_v10 = vld [vmem:[#allocation4 + $0x28] sm:$0xff]  }
 0x41a   : > { %v2602_v9 = vld [vmem:[#allocation4 + $0x18] sm:$0xff]   ;;  %v2515_v15 = vunpack.c.l.bf16 %v2603_v3  ;;  %v2531_v16 = vunpack.c.l.bf16 %v2607_v4  ;;  %v2527_v20 = vunpack.c.l.bf16 %v2606_v10  ;;  %v2516_v27 = vunpack.c.h.bf16 %v2603_v3 }
 0x41b   : > { %v2511_v18 = vunpack.c.l.bf16 %v2602_v9  ;;  %v2532_v28 = vunpack.c.h.bf16 %v2607_v4 }
 0x41c   : > { %2828 = vmatpush3.bf16.msra.mxu0 %v3041_v37  ;;  %2897 = vmatpush3.bf16.msra.mxu1 %v3041_v37  ;;  %v2512_v37 = vunpack.c.h.bf16 %v2602_v9 }
 0x41d   : > { %2829 = vmatprep.subr.bf16.mxu0 %v3042_v38  ;;  %2890 = vmatprep.subr.bf16.mxu1 %v3042_v38 }
 0x420   : > { %2830 = vmatpush3.bf16.msra.mxu0 %v3042_v38  ;;  %2898 = vmatpush3.bf16.msra.mxu1 %v3042_v38  ;;  %v2528_v38 = vunpack.c.h.bf16 %v2606_v10 }
 0x421   : > { %2831 = vmatprep.subr.bf16.mxu0 %v3043_v41  ;;  %2891 = vmatprep.subr.bf16.mxu1 %v3043_v41 }
 0x424   : > { %2832 = vmatpush3.bf16.msra.mxu0 %v3043_v41  ;;  %2899 = vmatpush3.bf16.msra.mxu1 %v3043_v41 }
 0x425   : > { %2833 = vmatprep.subr.bf16.mxu0 %v3044_v42  ;;  %2892 = vmatprep.subr.bf16.mxu1 %v3044_v42 }
 0x428   : > { %2834 = vmatpush3.bf16.msra.mxu0 %v3044_v42  ;;  %2900 = vmatpush3.bf16.msra.mxu1 %v3044_v42 }
 0x429   : > { %2835 = vmatprep.subr.bf16.mxu0 %v3045_v43  ;;  %2893 = vmatprep.subr.bf16.mxu1 %v3045_v43 }
 0x42c   : > { %2836 = vmatpush3.bf16.msra.mxu0 %v3045_v43  ;;  %2901 = vmatpush3.bf16.msra.mxu1 %v3045_v43 }
 0x42d   : > { %2837 = vmatprep.subr.bf16.mxu0 %v3046_v44  ;;  %2894 = vmatprep.subr.bf16.mxu1 %v3046_v44 }
 0x430   : > { %2838 = vmatpush3.bf16.msra.mxu0 %v3046_v44  ;;  %2902 = vmatpush3.bf16.msra.mxu1 %v3046_v44 }
 0x433   : > { %2840 = vmatmul.mubr.bf16.vlgmr.msra.gmra.mxu0 %v3049_v45  ;;  %2848 = vmatmul.mubr.bf16.vlgmr.msra.gmra.mxu1 %v3050_v46 }
 0x434   : > { %2843 = vmatprep.mubr.bf16.mxu0 %v3051_v47  ;;  %2851 = vmatprep.mubr.bf16.mxu1 %v3052_v48 }
 0x43b   : > { %2844 = vmatmul.mubr.bf16.gmra.mxu0 %v3053_v49  ;;  %2852 = vmatmul.mubr.bf16.gmra.mxu1 %v3054_v50 }
 0x4f3   : > { %v2841_v59 = vpop.f32.mrf.mxu0  ;;  %v2849_v60 = vpop.f32.mrf.mxu1 }
 0x4f4   : > { %v1846_v61 = vadd.f32 %v2841_v59, %v2507_v55  ;;  %v1878_v62 = vadd.f32 %v2849_v60, %v2523_v56 }
 0x4f5   : > { %v1837_v1 = vpop.f32.mrf.mxu0  ;;  %v1869_v2 = vpop.f32.mrf.mxu1 }
 0x4f6   : > { %1984 = vst [vmem:[#allocation14 + $0x10] sm:$0xff] %v1846_v61  ;;  %1992 = vst [vmem:[#allocation14 + $0x50] sm:$0xff] %v1878_v62  ;;  %v1838_v5 = vadd.f32 %v2503_v57, %v1837_v1  ;;  %v1870_v6 = vadd.f32 %v2519_v58, %v1869_v2 }
 0x4f7   : > { %v2842_v11 = vpop.f32.mrf.mxu0  ;;  %v2850_v12 = vpop.f32.mrf.mxu1 }
 0x4f8   : > { %1982 = vst [vmem:[#allocation14] sm:$0xff] %v1838_v5  ;;  %1990 = vst [vmem:[#allocation14 + $0x40] sm:$0xff] %v1870_v6  ;;  %v1849_v13 = vadd.f32 %v2842_v11, %v2508_v63  ;;  %v1881_v14 = vadd.f32 %v2850_v12, %v2524_v0 }
 0x4f9   : > { %v1840_v17 = vpop.f32.mrf.mxu0  ;;  %v1872_v19 = vpop.f32.mrf.mxu1 }
 0x4fa   : > { %v2541_v21 = vpack.c.bf16 %v1849_v13, %v1846_v61  ;;  %1985 = vst [vmem:[#allocation14 + $0x18] sm:$0xff] %v1849_v13  ;;  %v2561_v22 = vpack.c.bf16 %v1881_v14, %v1878_v62  ;;  %1993 = vst [vmem:[#allocation14 + $0x58] sm:$0xff] %v1881_v14  ;;  %v1841_v23 = vadd.f32 %v2504_v7, %v1840_v17 }
 0x4fb   : > { %v1873_v24 = vadd.f32 %v2520_v8, %v1872_v19  ;;  %v2845_v25 = vpop.f32.mrf.mxu0  ;;  %v2853_v26 = vpop.f32.mrf.mxu1 }
 0x4fc   : > { %2608 = vst [vmem:[#allocation2 + $0x8] sm:$0xff] %v2541_v21   ;;  %2612 = vst [vmem:[#allocation2 + $0x28] sm:$0xff] %v2561_v22   ;;  %v2536_v29 = vpack.c.bf16 %v1841_v23, %v1838_v5  ;;  %v1862_v31 = vadd.f32 %v2845_v25, %v2515_v15  ;;  %v1894_v32 = vadd.f32 %v2853_v26, %v2531_v16 }
 0x4fd   : > { %1983 = vst [vmem:[#allocation14 + $0x8] sm:$0xff] %v1841_v23  ;;  %v2556_v30 = vpack.c.bf16 %v1873_v24, %v1870_v6  ;;  %1991 = vst [vmem:[#allocation14 + $0x48] sm:$0xff] %v1873_v24  ;;  %v1853_v33 = vpop.f32.mrf.mxu0  ;;  %v1885_v34 = vpop.f32.mrf.mxu1 }
 0x4fe   : > { %2537 = vst [vmem:[#allocation2] sm:$0xff] %v2536_v29   ;;  %1988 = vst [vmem:[#allocation14 + $0x30] sm:$0xff] %v1862_v31  ;;  %v1854_v35 = vadd.f32 %v2511_v18, %v1853_v33  ;;  %v1886_v36 = vadd.f32 %v2527_v20, %v1885_v34 }
 0x4ff   : > { %2611 = vst [vmem:[#allocation2 + $0x20] sm:$0xff] %v2556_v30   ;;  %1996 = vst [vmem:[#allocation14 + $0x70] sm:$0xff] %v1894_v32  ;;  %v2846_v39 = vpop.f32.mrf.mxu0  ;;  %v2854_v40 = vpop.f32.mrf.mxu1 }
 0x500   : > { %1986 = vst [vmem:[#allocation14 + $0x20] sm:$0xff] %v1854_v35  ;;  %1994 = vst [vmem:[#allocation14 + $0x60] sm:$0xff] %v1886_v36  ;;  %v1865_v41 = vadd.f32 %v2846_v39, %v2516_v27  ;;  %v1897_v42 = vadd.f32 %v2854_v40, %v2532_v28 }
 0x501   : > { %v1856_v43 = vpop.f32.mrf.mxu0  ;;  %v1888_v44 = vpop.f32.mrf.mxu1 }
 0x502   : > { %v2551_v45 = vpack.c.bf16 %v1865_v41, %v1862_v31  ;;  %1989 = vst [vmem:[#allocation14 + $0x38] sm:$0xff] %v1865_v41  ;;  %v2571_v46 = vpack.c.bf16 %v1897_v42, %v1894_v32  ;;  %1997 = vst [vmem:[#allocation14 + $0x78] sm:$0xff] %v1897_v42  ;;  %v1857_v47 = vadd.f32 %v2512_v37, %v1856_v43 }
 0x503   : > { %v1889_v48 = vadd.f32 %v2528_v38, %v1888_v44 }
 0x504   : > { %2610 = vst [vmem:[#allocation2 + $0x18] sm:$0xff] %v2551_v45   ;;  %2614 = vst [vmem:[#allocation2 + $0x38] sm:$0xff] %v2571_v46   ;;  %v2546_v49 = vpack.c.bf16 %v1857_v47, %v1854_v35 }
 0x505   : > { %1987 = vst [vmem:[#allocation14 + $0x28] sm:$0xff] %v1857_v47  ;;  %v2566_v50 = vpack.c.bf16 %v1889_v48, %v1886_v36  ;;  %1995 = vst [vmem:[#allocation14 + $0x68] sm:$0xff] %v1889_v48 }
 0x506   : > { %2609 = vst [vmem:[#allocation2 + $0x10] sm:$0xff] %v2546_v49  }
 0x507   : > { %2613 = vst [vmem:[#allocation2 + $0x30] sm:$0xff] %v2566_v50  }
 0x508 PF: > { %p2955_p8 = scmp.eq.s32.totalorder %s3324_s30, 4  ;;  %s3260_s27 = smov [#allocation14]  }
 0x509   : > { %s2007_s25 = sshll.u32 %s3260_s27, 4  ;;  %s2008_s25 = int_to_ptr.vmem [resolvable:$true] %s2007_s25 }
 0x50a   : > { %s3185_s26 = scalar_lea.vmem %s2008_s25, 2048  ;;  %p3192_p1 = scmp.lt.s32.totalorder %s2008_s25, %s2008_s25 }
 0x50b   : > { %p3186_p9 = scmp.ne.s32.totalorder %s2008_s25, %s3185_s26  ;;  %p3193_p2 = scmp.lt.s32.totalorder %s3185_s26, %s3185_s26 }
 0x50d   : > { %p3187_p10 = pnand %p3186_p9, %p2955_p8  ;;  %p3194_p6 = por %p3193_p2, %p3192_p1 }
 0x50f   : > { %p3188_p0 = pneg %p3187_p10 }
 0x511   : > { %p3195_p3 = pnand %p3194_p6, %p3188_p0 }
 0x513   : > { %3198 = shalt.err (!%p3195_p3)
}
 0x514   : > { %s3261_s11 = smov 128   ;;  %s3262_s12 = smov 8  }
 0x515   : > { %2924 = dma.vmem_to_hbm [thread:$0]  (%p2955_p8), %s2008_s25, 2048, %s3506_s8, [#allocation7], %s3261_s11, %s3261_s11, %s3262_s12  }
 0x516   : > { %3238 = dma.done.wait (%p2955_p8), [#allocation7], 2048  }
 0x517   : > { %3240 = vsyncadd (%p2955_p8), [#allocation7], 4294965248 }
 0x518 PF: > { %s26_s29 = sadd.s32 1, %s3251_s29   ;;  %s3510_s27 = smov %s3247_s28 }
 0x519   : > { %p23_p4 = scmp.ge.s32.totalorder %s26_s29, 7   ;;  %s3511_s28 = smov %s3513_s9 }
 0x51b   :  { %25 = sbr.rel (!%p23_p4) target bundleno = 7 (0x7), region = 133 }
 0x520   :  { %2023 = vsyncpa [#allocation6], 1 }
 0x521   :  { %2025 = vsyncpa [#allocation6 + $0x1], 1 }
 0x522   :  { %2026 = vsyncpa [#allocation9], 1 }
 0x523   :  { %2028 = vsyncpa [#allocation9 + $0x1], 1 }
 0x524   :  { %2029 = vsyncpa [#allocation12], 1 }
 0x525   :  { %2030 = vsyncpa [#allocation7], 1 }
 0x526   :  { %2032 = vsyncpa [#allocation7 + $0x1], 1 }

</bundles_post_ra>
